<compile_context>
chip_gen: v5e
topology: v5e:2x2
jax: 0.10.0
libtpu: 0.0.40
codegen_flags: <defaults>
</compile_context>

<pallas_src>
import functools

import jax
import jax.numpy as jnp
import numpy as np
from jax.experimental import pallas as pl
from jax.experimental.pallas import tpu as pltpu


# Tap order t = (dy+1)*3 + (dx+1) matches the (ky, kx) flattening of the
# weights in _w_matmul_form below.
_TAP_OFFSETS = tuple((dy, dx) for dy in (-1, 0, 1) for dx in (-1, 0, 1))


# ----------------------------------------------------------------------------
# Fused Pallas kernel (one image per grid step)
# ----------------------------------------------------------------------------
def _cfm_resblock_kernel(feat_ref, nm_ref, mask_ref,
                         trans_w_ref, cf1_w_ref, cf2_w_ref,
                         cn1_w_ref, cn2_w_ref, g_w_ref,
                         scale_ref, bias_ref,
                         f_fin_ref, nm_fin_ref, *, H, W):
    """Fused CFMResBlock forward for one image.

    feat_ref / nm_ref   : (1, C, H*W)   activations, spatial flattened on lanes
    mask_ref            : (9, 1, H*W)   0/1 validity mask per 3x3 tap
    *_w_ref             : (Cout, 9*Cin) conv weights in matmul form
    scale_ref / bias_ref: (6, C, 1)     folded BN scale / bias per conv
    f_fin_ref/nm_fin_ref: (1, C, H*W)   outputs
    """
    HW = H * W
    feat = feat_ref[0]                              # (C, HW) f32
    nm = nm_ref[0]                                  # (C, HW) f32
    masks = [mask_ref[t] for t in range(9)]         # each (1, HW)

    def conv3x3(x, w_ref, idx, act):
        # im2col via static lane rotations: row block [tap, cin] of the
        # (9*Cin, HW) patch.  Edge taps are zeroed by the precomputed masks
        # (equivalent to SAME zero padding), so no padded copy is needed.
        rows = []
        for t, (dy, dx) in enumerate(_TAP_OFFSETS):
            s = dy * W + dx
            shifted = x if s == 0 else pltpu.roll(x, (-s) % HW, 1)
            rows.append(shifted * masks[t])
        patch = jnp.concatenate(rows, axis=0)       # (9*Cin, HW)
        y = jnp.dot(w_ref[...], patch,
                    preferred_element_type=jnp.float32)   # (Cout, HW)
        y = y * scale_ref[idx] + bias_ref[idx]      # per-channel affine (BN)
        if act == "relu":
            return jnp.maximum(y, 0.0)
        return jax.nn.sigmoid(y)

    cat = jnp.concatenate([feat, nm], axis=0)                   # (2C, HW)
    t = conv3x3(cat, trans_w_ref, 0, "relu")                    # trans
    f = conv3x3(feat, cf1_w_ref, 1, "relu")                     # conv_feature[0]
    f_out = conv3x3(f, cf2_w_ref, 2, "relu")                    # conv_feature[1]
    n = conv3x3(t, cn1_w_ref, 3, "relu")                        # conv_noisemap[0]
    nm_out = conv3x3(n, cn2_w_ref, 4, "relu")                   # conv_noisemap[1]
    g = conv3x3(nm_out, g_w_ref, 5, "sigmoid")                  # gamma

    # Fused elementwise tail: f = feature + f_out * gamma ; nm = org_nm + nm_out
    f_fin_ref[0] = (feat + f_out * g).astype(f_fin_ref.dtype)
    nm_fin_ref[0] = (nm + nm_out).astype(nm_fin_ref.dtype)


# ----------------------------------------------------------------------------
# Wrapper
# ----------------------------------------------------------------------------
def _make_tap_masks(H, W):
    """(9, 1, H*W) 0/1 masks: validity of each 3x3 tap at every output pixel."""
    p = np.arange(H * W)
    y, x = p // W, p % W
    m = np.zeros((9, 1, H * W), np.float32)
    for t, (dy, dx) in enumerate(_TAP_OFFSETS):
        valid = (y + dy >= 0) & (y + dy < H) & (x + dx >= 0) & (x + dx < W)
        m[t, 0] = valid.astype(np.float32)
    return jnp.asarray(m)


def _w_matmul_form(w_oihw):
    """OIHW (Cout, Cin, 3, 3) -> (Cout, 9*Cin), column = (ky*3 + kx)*Cin + cin."""
    co, ci = w_oihw.shape[0], w_oihw.shape[1]
    return jnp.transpose(w_oihw, (0, 2, 3, 1)).reshape(co, 9 * ci)


def _full_spec(shape):
    nd = len(shape)
    return pl.BlockSpec(shape, lambda n, _nd=nd: (0,) * _nd)


def cfm_resblock(feature, noise_map, P):
    """feature, noise_map: (N, C, H, W) f32 (NCHW, PyTorch layout)."""
    N, C, H, W = feature.shape
    HW = H * W

    # NCHW is contiguous in (H, W), so this reshape is free (no transpose).
    feat_flat = feature.reshape(N, C, HW)
    nm_flat = noise_map.reshape(N, C, HW)
    masks = _make_tap_masks(H, W)

    scales = jnp.stack([P["trans_s"], P["cf1_s"], P["cf2_s"],
                        P["cn1_s"], P["cn2_s"], P["g_s"]], 0).reshape(6, C, 1)
    biases = jnp.stack([P["trans_b"], P["cf1_b"], P["cf2_b"],
                        P["cn1_b"], P["cn2_b"], P["g_b"]], 0).reshape(6, C, 1)

    act_spec = pl.BlockSpec((1, C, HW), lambda n: (n, 0, 0))
    kernel = functools.partial(_cfm_resblock_kernel, H=H, W=W)

    f_fin, nm_fin = pl.pallas_call(
        kernel,
        out_shape=(jax.ShapeDtypeStruct((N, C, HW), jnp.float32),
                   jax.ShapeDtypeStruct((N, C, HW), jnp.float32)),
        grid=(N,),
        in_specs=[
            act_spec, act_spec,
            _full_spec((9, 1, HW)),
            _full_spec((C, 9 * 2 * C)),
            _full_spec((C, 9 * C)), _full_spec((C, 9 * C)),
            _full_spec((C, 9 * C)), _full_spec((C, 9 * C)),
            _full_spec((C, 9 * C)),
            _full_spec((6, C, 1)), _full_spec((6, C, 1)),
        ],
        out_specs=(act_spec, act_spec),
        compiler_params=pltpu.CompilerParams(
            dimension_semantics=("parallel",)),
    )(feat_flat, nm_flat, masks,
      _w_matmul_form(P["trans_w"]),
      _w_matmul_form(P["cf1_w"]), _w_matmul_form(P["cf2_w"]),
      _w_matmul_form(P["cn1_w"]), _w_matmul_form(P["cn2_w"]),
      _w_matmul_form(P["g_w"]),
      scales, biases)

    return f_fin.reshape(N, C, H, W), nm_fin.reshape(N, C, H, W)


# ----------------------------------------------------------------------------
# Pure-JAX reference (NCHW, matches the PyTorch module)
# ----------------------------------------------------------------------------
def _ref_conv3x3(x, w, scale, bias, act):
    y = jax.lax.conv_general_dilated(
        x, w, window_strides=(1, 1), padding="SAME",
        dimension_numbers=("NCHW", "OIHW", "NCHW"))
    y = y * scale[None, :, None, None] + bias[None, :, None, None]
    if act == "relu":
        return jnp.maximum(y, 0.0)
    return jax.nn.sigmoid(y)


def cfm_resblock_ref(feature, noise_map, P):
    cat = jnp.concatenate([feature, noise_map], axis=1)
    t = _ref_conv3x3(cat, P["trans_w"], P["trans_s"], P["trans_b"], "relu")
    f = _ref_conv3x3(feature, P["cf1_w"], P["cf1_s"], P["cf1_b"], "relu")
    f_out = _ref_conv3x3(f, P["cf2_w"], P["cf2_s"], P["cf2_b"], "relu")
    n = _ref_conv3x3(t, P["cn1_w"], P["cn1_s"], P["cn1_b"], "relu")
    nm_out = _ref_conv3x3(n, P["cn2_w"], P["cn2_s"], P["cn2_b"], "relu")
    g = _ref_conv3x3(nm_out, P["g_w"], P["g_s"], P["g_b"], "sigmoid")
    return feature + f_out * g, noise_map + nm_out


# ----------------------------------------------------------------------------
# Deterministic parameter init (PyTorch OIHW layout, BN folded to scale/bias)
# ----------------------------------------------------------------------------
def init_params(key, c):
    keys = iter(jax.random.split(key, 64))

    def conv_w(cin, cout):
        bound = 1.0 / np.sqrt(cin * 9)
        return jax.random.uniform(next(keys), (cout, cin, 3, 3),
                                  jnp.float32, -bound, bound)

    def bn_fold(cout, eps=1e-5):
        w = jax.random.uniform(next(keys), (cout,), jnp.float32, 0.5, 1.5)
        b = jax.random.uniform(next(keys), (cout,), jnp.float32, -0.5, 0.5)
        rm = jax.random.uniform(next(keys), (cout,), jnp.float32, -0.1, 0.1)
        rv = jax.random.uniform(next(keys), (cout,), jnp.float32, 0.5, 1.5)
        scale = w / jnp.sqrt(rv + eps)
        bias = b - rm * scale
        return scale, bias

    P = {}
    # trans: Conv2d(2c -> c, bias=False) + BN + ReLU
    P["trans_w"] = conv_w(2 * c, c)
    P["trans_s"], P["trans_b"] = bn_fold(c)
    # conv_feature: 2 x [Conv(c->c, bias=False) + BN + ReLU]
    P["cf1_w"] = conv_w(c, c); P["cf1_s"], P["cf1_b"] = bn_fold(c)
    P["cf2_w"] = conv_w(c, c); P["cf2_s"], P["cf2_b"] = bn_fold(c)
    # conv_noisemap: same structure
    P["cn1_w"] = conv_w(c, c); P["cn1_s"], P["cn1_b"] = bn_fold(c)
    P["cn2_w"] = conv_w(c, c); P["cn2_s"], P["cn2_b"] = bn_fold(c)
    # gamma: Conv(c->c, bias=True) + Sigmoid  -> scale=1, bias=conv bias
    P["g_w"] = conv_w(c, c)
    P["g_s"] = jnp.ones((c,), jnp.float32)
    bound = 1.0 / np.sqrt(c * 9)
    P["g_b"] = jax.random.uniform(next(keys), (c,), jnp.float32, -bound, bound)
    return P


# ----------------------------------------------------------------------------
if __name__ == "__main__":
    N, C, H, W = 2, 4, 16, 16        # H*W = 256 -> lane-dense output
    key = jax.random.PRNGKey(0)
    k_f, k_nm, k_p = jax.random.split(key, 3)

    # PyTorch-style NCHW inputs (no layout transpose needed for the kernel).
    feature = jax.random.normal(k_f, (N, C, H, W), jnp.float32)
    noise_map = jax.random.normal(k_nm, (N, C, H, W), jnp.float32)

    P = init_params(k_p, C)

    run = jax.jit(cfm_resblock)
    f_out, nm_out = run(feature, noise_map, P)
    jax.block_until_ready((f_out, nm_out))

    # Correctness check against a pure-JAX reference.
    f_ref, nm_ref = cfm_resblock_ref(feature, noise_map, P)
    np.testing.assert_allclose(np.asarray(f_out), np.asarray(f_ref),
                               rtol=1e-4, atol=1e-4)
    np.testing.assert_allclose(np.asarray(nm_out), np.asarray(nm_ref),
                               rtol=1e-4, atol=1e-4)

    print("KERNEL_OK")
</pallas_src>

<mosaic_0001>
module attributes {stable_mosaic.version = 11 : i64} {
  func.func @_cfm_resblock_kernel(%arg0: i32, %arg1: memref<1x4x256xf32, #tpu.memory_space<vmem>>, %arg2: memref<1x4x256xf32, #tpu.memory_space<vmem>>, %arg3: memref<9x1x256xf32, #tpu.memory_space<vmem>>, %arg4: memref<4x72xf32, #tpu.memory_space<vmem>>, %arg5: memref<4x36xf32, #tpu.memory_space<vmem>>, %arg6: memref<4x36xf32, #tpu.memory_space<vmem>>, %arg7: memref<4x36xf32, #tpu.memory_space<vmem>>, %arg8: memref<4x36xf32, #tpu.memory_space<vmem>>, %arg9: memref<4x36xf32, #tpu.memory_space<vmem>>, %arg10: memref<6x4x1xf32, #tpu.memory_space<vmem>>, %arg11: memref<6x4x1xf32, #tpu.memory_space<vmem>>, %arg12: memref<1x4x256xf32, #tpu.memory_space<vmem>>, %arg13: memref<1x4x256xf32, #tpu.memory_space<vmem>>) attributes {dimension_semantics = [#tpu.dimension_semantics<parallel>], iteration_bounds = array<i64: 2>, scalar_prefetch = 0 : i64, scratch_operands = 0 : i64, tpu.core_type = #tpu.core_type<tc>, window_params = [{transform_indices = @transform_0, window_bounds = array<i64: 1, 4, 256>}, {transform_indices = @transform_1, window_bounds = array<i64: 1, 4, 256>}, {pipeline_mode = #tpu.pipeline_mode<synchronous>, transform_indices = @transform_2, window_bounds = array<i64: 9, 1, 256>}, {pipeline_mode = #tpu.pipeline_mode<synchronous>, transform_indices = @transform_3, window_bounds = array<i64: 4, 72>}, {pipeline_mode = #tpu.pipeline_mode<synchronous>, transform_indices = @transform_4, window_bounds = array<i64: 4, 36>}, {pipeline_mode = #tpu.pipeline_mode<synchronous>, transform_indices = @transform_5, window_bounds = array<i64: 4, 36>}, {pipeline_mode = #tpu.pipeline_mode<synchronous>, transform_indices = @transform_6, window_bounds = array<i64: 4, 36>}, {pipeline_mode = #tpu.pipeline_mode<synchronous>, transform_indices = @transform_7, window_bounds = array<i64: 4, 36>}, {pipeline_mode = #tpu.pipeline_mode<synchronous>, transform_indices = @transform_8, window_bounds = array<i64: 4, 36>}, {pipeline_mode = #tpu.pipeline_mode<synchronous>, transform_indices = @transform_9, window_bounds = array<i64: 6, 4, 1>}, {pipeline_mode = #tpu.pipeline_mode<synchronous>, transform_indices = @transform_10, window_bounds = array<i64: 6, 4, 1>}, {transform_indices = @transform_11, window_bounds = array<i64: 1, 4, 256>}, {transform_indices = @transform_12, window_bounds = array<i64: 1, 4, 256>}]} {
    %c0 = arith.constant 0 : index
    %c0_0 = arith.constant 0 : index
    %c0_1 = arith.constant 0 : index
    %0 = vector.load %arg1[%c0, %c0_0, %c0_1] : memref<1x4x256xf32, #tpu.memory_space<vmem>>, vector<1x4x256xf32>
    %1 = vector.shape_cast %0 : vector<1x4x256xf32> to vector<4x256xf32>
    %c0_2 = arith.constant 0 : index
    %c0_3 = arith.constant 0 : index
    %c0_4 = arith.constant 0 : index
    %2 = vector.load %arg2[%c0_2, %c0_3, %c0_4] : memref<1x4x256xf32, #tpu.memory_space<vmem>>, vector<1x4x256xf32>
    %3 = vector.shape_cast %2 : vector<1x4x256xf32> to vector<4x256xf32>
    %c0_5 = arith.constant 0 : index
    %c0_6 = arith.constant 0 : index
    %c0_7 = arith.constant 0 : index
    %4 = vector.load %arg3[%c0_5, %c0_6, %c0_7] : memref<9x1x256xf32, #tpu.memory_space<vmem>>, vector<1x1x256xf32>
    %5 = vector.shape_cast %4 : vector<1x1x256xf32> to vector<1x256xf32>
    %c1 = arith.constant 1 : index
    %c0_8 = arith.constant 0 : index
    %c0_9 = arith.constant 0 : index
    %6 = vector.load %arg3[%c1, %c0_8, %c0_9] : memref<9x1x256xf32, #tpu.memory_space<vmem>>, vector<1x1x256xf32>
    %7 = vector.shape_cast %6 : vector<1x1x256xf32> to vector<1x256xf32>
    %c2 = arith.constant 2 : index
    %c0_10 = arith.constant 0 : index
    %c0_11 = arith.constant 0 : index
    %8 = vector.load %arg3[%c2, %c0_10, %c0_11] : memref<9x1x256xf32, #tpu.memory_space<vmem>>, vector<1x1x256xf32>
    %9 = vector.shape_cast %8 : vector<1x1x256xf32> to vector<1x256xf32>
    %c3 = arith.constant 3 : index
    %c0_12 = arith.constant 0 : index
    %c0_13 = arith.constant 0 : index
    %10 = vector.load %arg3[%c3, %c0_12, %c0_13] : memref<9x1x256xf32, #tpu.memory_space<vmem>>, vector<1x1x256xf32>
    %11 = vector.shape_cast %10 : vector<1x1x256xf32> to vector<1x256xf32>
    %c4 = arith.constant 4 : index
    %c0_14 = arith.constant 0 : index
    %c0_15 = arith.constant 0 : index
    %12 = vector.load %arg3[%c4, %c0_14, %c0_15] : memref<9x1x256xf32, #tpu.memory_space<vmem>>, vector<1x1x256xf32>
    %13 = vector.shape_cast %12 : vector<1x1x256xf32> to vector<1x256xf32>
    %c5 = arith.constant 5 : index
    %c0_16 = arith.constant 0 : index
    %c0_17 = arith.constant 0 : index
    %14 = vector.load %arg3[%c5, %c0_16, %c0_17] : memref<9x1x256xf32, #tpu.memory_space<vmem>>, vector<1x1x256xf32>
    %15 = vector.shape_cast %14 : vector<1x1x256xf32> to vector<1x256xf32>
    %c6 = arith.constant 6 : index
    %c0_18 = arith.constant 0 : index
    %c0_19 = arith.constant 0 : index
    %16 = vector.load %arg3[%c6, %c0_18, %c0_19] : memref<9x1x256xf32, #tpu.memory_space<vmem>>, vector<1x1x256xf32>
    %17 = vector.shape_cast %16 : vector<1x1x256xf32> to vector<1x256xf32>
    %c7 = arith.constant 7 : index
    %c0_20 = arith.constant 0 : index
    %c0_21 = arith.constant 0 : index
    %18 = vector.load %arg3[%c7, %c0_20, %c0_21] : memref<9x1x256xf32, #tpu.memory_space<vmem>>, vector<1x1x256xf32>
    %19 = vector.shape_cast %18 : vector<1x1x256xf32> to vector<1x256xf32>
    %c8 = arith.constant 8 : index
    %c0_22 = arith.constant 0 : index
    %c0_23 = arith.constant 0 : index
    %20 = vector.load %arg3[%c8, %c0_22, %c0_23] : memref<9x1x256xf32, #tpu.memory_space<vmem>>, vector<1x1x256xf32>
    %21 = vector.shape_cast %20 : vector<1x1x256xf32> to vector<1x256xf32>
    %22 = tpu.concatenate %1, %3 in 0 : vector<4x256xf32>, vector<4x256xf32> -> vector<8x256xf32>
    %c17_i32 = arith.constant 17 : i32
    %23 = tpu.dynamic_rotate %22 by %c17_i32 dim 1 : vector<8x256xf32>, i32 -> vector<8x256xf32>
    %24 = vector.broadcast %5 : vector<1x256xf32> to vector<8x256xf32>
    %25 = arith.mulf %23, %24 : vector<8x256xf32>
    %c16_i32 = arith.constant 16 : i32
    %26 = tpu.dynamic_rotate %22 by %c16_i32 dim 1 : vector<8x256xf32>, i32 -> vector<8x256xf32>
    %27 = vector.broadcast %7 : vector<1x256xf32> to vector<8x256xf32>
    %28 = arith.mulf %26, %27 : vector<8x256xf32>
    %c15_i32 = arith.constant 15 : i32
    %29 = tpu.dynamic_rotate %22 by %c15_i32 dim 1 : vector<8x256xf32>, i32 -> vector<8x256xf32>
    %30 = vector.broadcast %9 : vector<1x256xf32> to vector<8x256xf32>
    %31 = arith.mulf %29, %30 : vector<8x256xf32>
    %c1_i32 = arith.constant 1 : i32
    %32 = tpu.dynamic_rotate %22 by %c1_i32 dim 1 : vector<8x256xf32>, i32 -> vector<8x256xf32>
    %33 = vector.broadcast %11 : vector<1x256xf32> to vector<8x256xf32>
    %34 = arith.mulf %32, %33 : vector<8x256xf32>
    %35 = vector.broadcast %13 : vector<1x256xf32> to vector<8x256xf32>
    %36 = arith.mulf %22, %35 : vector<8x256xf32>
    %c255_i32 = arith.constant 255 : i32
    %37 = tpu.dynamic_rotate %22 by %c255_i32 dim 1 : vector<8x256xf32>, i32 -> vector<8x256xf32>
    %38 = vector.broadcast %15 : vector<1x256xf32> to vector<8x256xf32>
    %39 = arith.mulf %37, %38 : vector<8x256xf32>
    %c241_i32 = arith.constant 241 : i32
    %40 = tpu.dynamic_rotate %22 by %c241_i32 dim 1 : vector<8x256xf32>, i32 -> vector<8x256xf32>
    %41 = vector.broadcast %17 : vector<1x256xf32> to vector<8x256xf32>
    %42 = arith.mulf %40, %41 : vector<8x256xf32>
    %c240_i32 = arith.constant 240 : i32
    %43 = tpu.dynamic_rotate %22 by %c240_i32 dim 1 : vector<8x256xf32>, i32 -> vector<8x256xf32>
    %44 = vector.broadcast %19 : vector<1x256xf32> to vector<8x256xf32>
    %45 = arith.mulf %43, %44 : vector<8x256xf32>
    %c239_i32 = arith.constant 239 : i32
    %46 = tpu.dynamic_rotate %22 by %c239_i32 dim 1 : vector<8x256xf32>, i32 -> vector<8x256xf32>
    %47 = vector.broadcast %21 : vector<1x256xf32> to vector<8x256xf32>
    %48 = arith.mulf %46, %47 : vector<8x256xf32>
    %49 = tpu.concatenate %25, %28, %31, %34, %36, %39, %42, %45, %48 in 0 : vector<8x256xf32>, vector<8x256xf32>, vector<8x256xf32>, vector<8x256xf32>, vector<8x256xf32>, vector<8x256xf32>, vector<8x256xf32>, vector<8x256xf32>, vector<8x256xf32> -> vector<72x256xf32>
    %c0_24 = arith.constant 0 : index
    %c0_25 = arith.constant 0 : index
    %50 = vector.load %arg4[%c0_24, %c0_25] : memref<4x72xf32, #tpu.memory_space<vmem>>, vector<4x72xf32>
    %cst = arith.constant dense<0.000000e+00> : vector<4x256xf32>
    %51 = tpu.matmul %50, %49, %cst {dimension_numbers = #tpu.dot_dimension_numbers<[1], [0], [0], [1], [0, 0, 1, 1], [], []>} : vector<4x72xf32>, vector<72x256xf32>, vector<4x256xf32> -> vector<4x256xf32>
    %c0_26 = arith.constant 0 : index
    %c0_27 = arith.constant 0 : index
    %c0_28 = arith.constant 0 : index
    %52 = vector.load %arg10[%c0_26, %c0_27, %c0_28] : memref<6x4x1xf32, #tpu.memory_space<vmem>>, vector<1x4x1xf32>
    %53 = vector.shape_cast %52 : vector<1x4x1xf32> to vector<4x1xf32>
    %54 = vector.broadcast %53 : vector<4x1xf32> to vector<4x256xf32>
    %55 = arith.mulf %51, %54 : vector<4x256xf32>
    %c0_29 = arith.constant 0 : index
    %c0_30 = arith.constant 0 : index
    %c0_31 = arith.constant 0 : index
    %56 = vector.load %arg11[%c0_29, %c0_30, %c0_31] : memref<6x4x1xf32, #tpu.memory_space<vmem>>, vector<1x4x1xf32>
    %57 = vector.shape_cast %56 : vector<1x4x1xf32> to vector<4x1xf32>
    %58 = vector.broadcast %57 : vector<4x1xf32> to vector<4x256xf32>
    %59 = arith.addf %55, %58 : vector<4x256xf32>
    %cst_32 = arith.constant 0.000000e+00 : f32
    %60 = vector.broadcast %cst_32 : f32 to vector<4x256xf32>
    %61 = arith.maximumf %59, %60 : vector<4x256xf32>
    %c17_i32_33 = arith.constant 17 : i32
    %62 = tpu.dynamic_rotate %1 by %c17_i32_33 dim 1 : vector<4x256xf32>, i32 -> vector<4x256xf32>
    %63 = vector.broadcast %5 : vector<1x256xf32> to vector<4x256xf32>
    %64 = arith.mulf %62, %63 : vector<4x256xf32>
    %c16_i32_34 = arith.constant 16 : i32
    %65 = tpu.dynamic_rotate %1 by %c16_i32_34 dim 1 : vector<4x256xf32>, i32 -> vector<4x256xf32>
    %66 = vector.broadcast %7 : vector<1x256xf32> to vector<4x256xf32>
    %67 = arith.mulf %65, %66 : vector<4x256xf32>
    %c15_i32_35 = arith.constant 15 : i32
    %68 = tpu.dynamic_rotate %1 by %c15_i32_35 dim 1 : vector<4x256xf32>, i32 -> vector<4x256xf32>
    %69 = vector.broadcast %9 : vector<1x256xf32> to vector<4x256xf32>
    %70 = arith.mulf %68, %69 : vector<4x256xf32>
    %c1_i32_36 = arith.constant 1 : i32
    %71 = tpu.dynamic_rotate %1 by %c1_i32_36 dim 1 : vector<4x256xf32>, i32 -> vector<4x256xf32>
    %72 = vector.broadcast %11 : vector<1x256xf32> to vector<4x256xf32>
    %73 = arith.mulf %71, %72 : vector<4x256xf32>
    %74 = vector.broadcast %13 : vector<1x256xf32> to vector<4x256xf32>
    %75 = arith.mulf %1, %74 : vector<4x256xf32>
    %c255_i32_37 = arith.constant 255 : i32
    %76 = tpu.dynamic_rotate %1 by %c255_i32_37 dim 1 : vector<4x256xf32>, i32 -> vector<4x256xf32>
    %77 = vector.broadcast %15 : vector<1x256xf32> to vector<4x256xf32>
    %78 = arith.mulf %76, %77 : vector<4x256xf32>
    %c241_i32_38 = arith.constant 241 : i32
    %79 = tpu.dynamic_rotate %1 by %c241_i32_38 dim 1 : vector<4x256xf32>, i32 -> vector<4x256xf32>
    %80 = vector.broadcast %17 : vector<1x256xf32> to vector<4x256xf32>
    %81 = arith.mulf %79, %80 : vector<4x256xf32>
    %c240_i32_39 = arith.constant 240 : i32
    %82 = tpu.dynamic_rotate %1 by %c240_i32_39 dim 1 : vector<4x256xf32>, i32 -> vector<4x256xf32>
    %83 = vector.broadcast %19 : vector<1x256xf32> to vector<4x256xf32>
    %84 = arith.mulf %82, %83 : vector<4x256xf32>
    %c239_i32_40 = arith.constant 239 : i32
    %85 = tpu.dynamic_rotate %1 by %c239_i32_40 dim 1 : vector<4x256xf32>, i32 -> vector<4x256xf32>
    %86 = vector.broadcast %21 : vector<1x256xf32> to vector<4x256xf32>
    %87 = arith.mulf %85, %86 : vector<4x256xf32>
    %88 = tpu.concatenate %64, %67, %70, %73, %75, %78, %81, %84, %87 in 0 : vector<4x256xf32>, vector<4x256xf32>, vector<4x256xf32>, vector<4x256xf32>, vector<4x256xf32>, vector<4x256xf32>, vector<4x256xf32>, vector<4x256xf32>, vector<4x256xf32> -> vector<36x256xf32>
    %c0_41 = arith.constant 0 : index
    %c0_42 = arith.constant 0 : index
    %89 = vector.load %arg5[%c0_41, %c0_42] : memref<4x36xf32, #tpu.memory_space<vmem>>, vector<4x36xf32>
    %cst_43 = arith.constant dense<0.000000e+00> : vector<4x256xf32>
    %90 = tpu.matmul %89, %88, %cst_43 {dimension_numbers = #tpu.dot_dimension_numbers<[1], [0], [0], [1], [0, 0, 1, 1], [], []>} : vector<4x36xf32>, vector<36x256xf32>, vector<4x256xf32> -> vector<4x256xf32>
    %c1_44 = arith.constant 1 : index
    %c0_45 = arith.constant 0 : index
    %c0_46 = arith.constant 0 : index
    %91 = vector.load %arg10[%c1_44, %c0_45, %c0_46] : memref<6x4x1xf32, #tpu.memory_space<vmem>>, vector<1x4x1xf32>
    %92 = vector.shape_cast %91 : vector<1x4x1xf32> to vector<4x1xf32>
    %93 = vector.broadcast %92 : vector<4x1xf32> to vector<4x256xf32>
    %94 = arith.mulf %90, %93 : vector<4x256xf32>
    %c1_47 = arith.constant 1 : index
    %c0_48 = arith.constant 0 : index
    %c0_49 = arith.constant 0 : index
    %95 = vector.load %arg11[%c1_47, %c0_48, %c0_49] : memref<6x4x1xf32, #tpu.memory_space<vmem>>, vector<1x4x1xf32>
    %96 = vector.shape_cast %95 : vector<1x4x1xf32> to vector<4x1xf32>
    %97 = vector.broadcast %96 : vector<4x1xf32> to vector<4x256xf32>
    %98 = arith.addf %94, %97 : vector<4x256xf32>
    %cst_50 = arith.constant 0.000000e+00 : f32
    %99 = vector.broadcast %cst_50 : f32 to vector<4x256xf32>
    %100 = arith.maximumf %98, %99 : vector<4x256xf32>
    %c17_i32_51 = arith.constant 17 : i32
    %101 = tpu.dynamic_rotate %100 by %c17_i32_51 dim 1 : vector<4x256xf32>, i32 -> vector<4x256xf32>
    %102 = vector.broadcast %5 : vector<1x256xf32> to vector<4x256xf32>
    %103 = arith.mulf %101, %102 : vector<4x256xf32>
    %c16_i32_52 = arith.constant 16 : i32
    %104 = tpu.dynamic_rotate %100 by %c16_i32_52 dim 1 : vector<4x256xf32>, i32 -> vector<4x256xf32>
    %105 = vector.broadcast %7 : vector<1x256xf32> to vector<4x256xf32>
    %106 = arith.mulf %104, %105 : vector<4x256xf32>
    %c15_i32_53 = arith.constant 15 : i32
    %107 = tpu.dynamic_rotate %100 by %c15_i32_53 dim 1 : vector<4x256xf32>, i32 -> vector<4x256xf32>
    %108 = vector.broadcast %9 : vector<1x256xf32> to vector<4x256xf32>
    %109 = arith.mulf %107, %108 : vector<4x256xf32>
    %c1_i32_54 = arith.constant 1 : i32
    %110 = tpu.dynamic_rotate %100 by %c1_i32_54 dim 1 : vector<4x256xf32>, i32 -> vector<4x256xf32>
    %111 = vector.broadcast %11 : vector<1x256xf32> to vector<4x256xf32>
    %112 = arith.mulf %110, %111 : vector<4x256xf32>
    %113 = vector.broadcast %13 : vector<1x256xf32> to vector<4x256xf32>
    %114 = arith.mulf %100, %113 : vector<4x256xf32>
    %c255_i32_55 = arith.constant 255 : i32
    %115 = tpu.dynamic_rotate %100 by %c255_i32_55 dim 1 : vector<4x256xf32>, i32 -> vector<4x256xf32>
    %116 = vector.broadcast %15 : vector<1x256xf32> to vector<4x256xf32>
    %117 = arith.mulf %115, %116 : vector<4x256xf32>
    %c241_i32_56 = arith.constant 241 : i32
    %118 = tpu.dynamic_rotate %100 by %c241_i32_56 dim 1 : vector<4x256xf32>, i32 -> vector<4x256xf32>
    %119 = vector.broadcast %17 : vector<1x256xf32> to vector<4x256xf32>
    %120 = arith.mulf %118, %119 : vector<4x256xf32>
    %c240_i32_57 = arith.constant 240 : i32
    %121 = tpu.dynamic_rotate %100 by %c240_i32_57 dim 1 : vector<4x256xf32>, i32 -> vector<4x256xf32>
    %122 = vector.broadcast %19 : vector<1x256xf32> to vector<4x256xf32>
    %123 = arith.mulf %121, %122 : vector<4x256xf32>
    %c239_i32_58 = arith.constant 239 : i32
    %124 = tpu.dynamic_rotate %100 by %c239_i32_58 dim 1 : vector<4x256xf32>, i32 -> vector<4x256xf32>
    %125 = vector.broadcast %21 : vector<1x256xf32> to vector<4x256xf32>
    %126 = arith.mulf %124, %125 : vector<4x256xf32>
    %127 = tpu.concatenate %103, %106, %109, %112, %114, %117, %120, %123, %126 in 0 : vector<4x256xf32>, vector<4x256xf32>, vector<4x256xf32>, vector<4x256xf32>, vector<4x256xf32>, vector<4x256xf32>, vector<4x256xf32>, vector<4x256xf32>, vector<4x256xf32> -> vector<36x256xf32>
    %c0_59 = arith.constant 0 : index
    %c0_60 = arith.constant 0 : index
    %128 = vector.load %arg6[%c0_59, %c0_60] : memref<4x36xf32, #tpu.memory_space<vmem>>, vector<4x36xf32>
    %cst_61 = arith.constant dense<0.000000e+00> : vector<4x256xf32>
    %129 = tpu.matmul %128, %127, %cst_61 {dimension_numbers = #tpu.dot_dimension_numbers<[1], [0], [0], [1], [0, 0, 1, 1], [], []>} : vector<4x36xf32>, vector<36x256xf32>, vector<4x256xf32> -> vector<4x256xf32>
    %c2_62 = arith.constant 2 : index
    %c0_63 = arith.constant 0 : index
    %c0_64 = arith.constant 0 : index
    %130 = vector.load %arg10[%c2_62, %c0_63, %c0_64] : memref<6x4x1xf32, #tpu.memory_space<vmem>>, vector<1x4x1xf32>
    %131 = vector.shape_cast %130 : vector<1x4x1xf32> to vector<4x1xf32>
    %132 = vector.broadcast %131 : vector<4x1xf32> to vector<4x256xf32>
    %133 = arith.mulf %129, %132 : vector<4x256xf32>
    %c2_65 = arith.constant 2 : index
    %c0_66 = arith.constant 0 : index
    %c0_67 = arith.constant 0 : index
    %134 = vector.load %arg11[%c2_65, %c0_66, %c0_67] : memref<6x4x1xf32, #tpu.memory_space<vmem>>, vector<1x4x1xf32>
    %135 = vector.shape_cast %134 : vector<1x4x1xf32> to vector<4x1xf32>
    %136 = vector.broadcast %135 : vector<4x1xf32> to vector<4x256xf32>
    %137 = arith.addf %133, %136 : vector<4x256xf32>
    %cst_68 = arith.constant 0.000000e+00 : f32
    %138 = vector.broadcast %cst_68 : f32 to vector<4x256xf32>
    %139 = arith.maximumf %137, %138 : vector<4x256xf32>
    %c17_i32_69 = arith.constant 17 : i32
    %140 = tpu.dynamic_rotate %61 by %c17_i32_69 dim 1 : vector<4x256xf32>, i32 -> vector<4x256xf32>
    %141 = vector.broadcast %5 : vector<1x256xf32> to vector<4x256xf32>
    %142 = arith.mulf %140, %141 : vector<4x256xf32>
    %c16_i32_70 = arith.constant 16 : i32
    %143 = tpu.dynamic_rotate %61 by %c16_i32_70 dim 1 : vector<4x256xf32>, i32 -> vector<4x256xf32>
    %144 = vector.broadcast %7 : vector<1x256xf32> to vector<4x256xf32>
    %145 = arith.mulf %143, %144 : vector<4x256xf32>
    %c15_i32_71 = arith.constant 15 : i32
    %146 = tpu.dynamic_rotate %61 by %c15_i32_71 dim 1 : vector<4x256xf32>, i32 -> vector<4x256xf32>
    %147 = vector.broadcast %9 : vector<1x256xf32> to vector<4x256xf32>
    %148 = arith.mulf %146, %147 : vector<4x256xf32>
    %c1_i32_72 = arith.constant 1 : i32
    %149 = tpu.dynamic_rotate %61 by %c1_i32_72 dim 1 : vector<4x256xf32>, i32 -> vector<4x256xf32>
    %150 = vector.broadcast %11 : vector<1x256xf32> to vector<4x256xf32>
    %151 = arith.mulf %149, %150 : vector<4x256xf32>
    %152 = vector.broadcast %13 : vector<1x256xf32> to vector<4x256xf32>
    %153 = arith.mulf %61, %152 : vector<4x256xf32>
    %c255_i32_73 = arith.constant 255 : i32
    %154 = tpu.dynamic_rotate %61 by %c255_i32_73 dim 1 : vector<4x256xf32>, i32 -> vector<4x256xf32>
    %155 = vector.broadcast %15 : vector<1x256xf32> to vector<4x256xf32>
    %156 = arith.mulf %154, %155 : vector<4x256xf32>
    %c241_i32_74 = arith.constant 241 : i32
    %157 = tpu.dynamic_rotate %61 by %c241_i32_74 dim 1 : vector<4x256xf32>, i32 -> vector<4x256xf32>
    %158 = vector.broadcast %17 : vector<1x256xf32> to vector<4x256xf32>
    %159 = arith.mulf %157, %158 : vector<4x256xf32>
    %c240_i32_75 = arith.constant 240 : i32
    %160 = tpu.dynamic_rotate %61 by %c240_i32_75 dim 1 : vector<4x256xf32>, i32 -> vector<4x256xf32>
    %161 = vector.broadcast %19 : vector<1x256xf32> to vector<4x256xf32>
    %162 = arith.mulf %160, %161 : vector<4x256xf32>
    %c239_i32_76 = arith.constant 239 : i32
    %163 = tpu.dynamic_rotate %61 by %c239_i32_76 dim 1 : vector<4x256xf32>, i32 -> vector<4x256xf32>
    %164 = vector.broadcast %21 : vector<1x256xf32> to vector<4x256xf32>
    %165 = arith.mulf %163, %164 : vector<4x256xf32>
    %166 = tpu.concatenate %142, %145, %148, %151, %153, %156, %159, %162, %165 in 0 : vector<4x256xf32>, vector<4x256xf32>, vector<4x256xf32>, vector<4x256xf32>, vector<4x256xf32>, vector<4x256xf32>, vector<4x256xf32>, vector<4x256xf32>, vector<4x256xf32> -> vector<36x256xf32>
    %c0_77 = arith.constant 0 : index
    %c0_78 = arith.constant 0 : index
    %167 = vector.load %arg7[%c0_77, %c0_78] : memref<4x36xf32, #tpu.memory_space<vmem>>, vector<4x36xf32>
    %cst_79 = arith.constant dense<0.000000e+00> : vector<4x256xf32>
    %168 = tpu.matmul %167, %166, %cst_79 {dimension_numbers = #tpu.dot_dimension_numbers<[1], [0], [0], [1], [0, 0, 1, 1], [], []>} : vector<4x36xf32>, vector<36x256xf32>, vector<4x256xf32> -> vector<4x256xf32>
    %c3_80 = arith.constant 3 : index
    %c0_81 = arith.constant 0 : index
    %c0_82 = arith.constant 0 : index
    %169 = vector.load %arg10[%c3_80, %c0_81, %c0_82] : memref<6x4x1xf32, #tpu.memory_space<vmem>>, vector<1x4x1xf32>
    %170 = vector.shape_cast %169 : vector<1x4x1xf32> to vector<4x1xf32>
    %171 = vector.broadcast %170 : vector<4x1xf32> to vector<4x256xf32>
    %172 = arith.mulf %168, %171 : vector<4x256xf32>
    %c3_83 = arith.constant 3 : index
    %c0_84 = arith.constant 0 : index
    %c0_85 = arith.constant 0 : index
    %173 = vector.load %arg11[%c3_83, %c0_84, %c0_85] : memref<6x4x1xf32, #tpu.memory_space<vmem>>, vector<1x4x1xf32>
    %174 = vector.shape_cast %173 : vector<1x4x1xf32> to vector<4x1xf32>
    %175 = vector.broadcast %174 : vector<4x1xf32> to vector<4x256xf32>
    %176 = arith.addf %172, %175 : vector<4x256xf32>
    %cst_86 = arith.constant 0.000000e+00 : f32
    %177 = vector.broadcast %cst_86 : f32 to vector<4x256xf32>
    %178 = arith.maximumf %176, %177 : vector<4x256xf32>
    %c17_i32_87 = arith.constant 17 : i32
    %179 = tpu.dynamic_rotate %178 by %c17_i32_87 dim 1 : vector<4x256xf32>, i32 -> vector<4x256xf32>
    %180 = vector.broadcast %5 : vector<1x256xf32> to vector<4x256xf32>
    %181 = arith.mulf %179, %180 : vector<4x256xf32>
    %c16_i32_88 = arith.constant 16 : i32
    %182 = tpu.dynamic_rotate %178 by %c16_i32_88 dim 1 : vector<4x256xf32>, i32 -> vector<4x256xf32>
    %183 = vector.broadcast %7 : vector<1x256xf32> to vector<4x256xf32>
    %184 = arith.mulf %182, %183 : vector<4x256xf32>
    %c15_i32_89 = arith.constant 15 : i32
    %185 = tpu.dynamic_rotate %178 by %c15_i32_89 dim 1 : vector<4x256xf32>, i32 -> vector<4x256xf32>
    %186 = vector.broadcast %9 : vector<1x256xf32> to vector<4x256xf32>
    %187 = arith.mulf %185, %186 : vector<4x256xf32>
    %c1_i32_90 = arith.constant 1 : i32
    %188 = tpu.dynamic_rotate %178 by %c1_i32_90 dim 1 : vector<4x256xf32>, i32 -> vector<4x256xf32>
    %189 = vector.broadcast %11 : vector<1x256xf32> to vector<4x256xf32>
    %190 = arith.mulf %188, %189 : vector<4x256xf32>
    %191 = vector.broadcast %13 : vector<1x256xf32> to vector<4x256xf32>
    %192 = arith.mulf %178, %191 : vector<4x256xf32>
    %c255_i32_91 = arith.constant 255 : i32
    %193 = tpu.dynamic_rotate %178 by %c255_i32_91 dim 1 : vector<4x256xf32>, i32 -> vector<4x256xf32>
    %194 = vector.broadcast %15 : vector<1x256xf32> to vector<4x256xf32>
    %195 = arith.mulf %193, %194 : vector<4x256xf32>
    %c241_i32_92 = arith.constant 241 : i32
    %196 = tpu.dynamic_rotate %178 by %c241_i32_92 dim 1 : vector<4x256xf32>, i32 -> vector<4x256xf32>
    %197 = vector.broadcast %17 : vector<1x256xf32> to vector<4x256xf32>
    %198 = arith.mulf %196, %197 : vector<4x256xf32>
    %c240_i32_93 = arith.constant 240 : i32
    %199 = tpu.dynamic_rotate %178 by %c240_i32_93 dim 1 : vector<4x256xf32>, i32 -> vector<4x256xf32>
    %200 = vector.broadcast %19 : vector<1x256xf32> to vector<4x256xf32>
    %201 = arith.mulf %199, %200 : vector<4x256xf32>
    %c239_i32_94 = arith.constant 239 : i32
    %202 = tpu.dynamic_rotate %178 by %c239_i32_94 dim 1 : vector<4x256xf32>, i32 -> vector<4x256xf32>
    %203 = vector.broadcast %21 : vector<1x256xf32> to vector<4x256xf32>
    %204 = arith.mulf %202, %203 : vector<4x256xf32>
    %205 = tpu.concatenate %181, %184, %187, %190, %192, %195, %198, %201, %204 in 0 : vector<4x256xf32>, vector<4x256xf32>, vector<4x256xf32>, vector<4x256xf32>, vector<4x256xf32>, vector<4x256xf32>, vector<4x256xf32>, vector<4x256xf32>, vector<4x256xf32> -> vector<36x256xf32>
    %c0_95 = arith.constant 0 : index
    %c0_96 = arith.constant 0 : index
    %206 = vector.load %arg8[%c0_95, %c0_96] : memref<4x36xf32, #tpu.memory_space<vmem>>, vector<4x36xf32>
    %cst_97 = arith.constant dense<0.000000e+00> : vector<4x256xf32>
    %207 = tpu.matmul %206, %205, %cst_97 {dimension_numbers = #tpu.dot_dimension_numbers<[1], [0], [0], [1], [0, 0, 1, 1], [], []>} : vector<4x36xf32>, vector<36x256xf32>, vector<4x256xf32> -> vector<4x256xf32>
    %c4_98 = arith.constant 4 : index
    %c0_99 = arith.constant 0 : index
    %c0_100 = arith.constant 0 : index
    %208 = vector.load %arg10[%c4_98, %c0_99, %c0_100] : memref<6x4x1xf32, #tpu.memory_space<vmem>>, vector<1x4x1xf32>
    %209 = vector.shape_cast %208 : vector<1x4x1xf32> to vector<4x1xf32>
    %210 = vector.broadcast %209 : vector<4x1xf32> to vector<4x256xf32>
    %211 = arith.mulf %207, %210 : vector<4x256xf32>
    %c4_101 = arith.constant 4 : index
    %c0_102 = arith.constant 0 : index
    %c0_103 = arith.constant 0 : index
    %212 = vector.load %arg11[%c4_101, %c0_102, %c0_103] : memref<6x4x1xf32, #tpu.memory_space<vmem>>, vector<1x4x1xf32>
    %213 = vector.shape_cast %212 : vector<1x4x1xf32> to vector<4x1xf32>
    %214 = vector.broadcast %213 : vector<4x1xf32> to vector<4x256xf32>
    %215 = arith.addf %211, %214 : vector<4x256xf32>
    %cst_104 = arith.constant 0.000000e+00 : f32
    %216 = vector.broadcast %cst_104 : f32 to vector<4x256xf32>
    %217 = arith.maximumf %215, %216 : vector<4x256xf32>
    %c17_i32_105 = arith.constant 17 : i32
    %218 = tpu.dynamic_rotate %217 by %c17_i32_105 dim 1 : vector<4x256xf32>, i32 -> vector<4x256xf32>
    %219 = vector.broadcast %5 : vector<1x256xf32> to vector<4x256xf32>
    %220 = arith.mulf %218, %219 : vector<4x256xf32>
    %c16_i32_106 = arith.constant 16 : i32
    %221 = tpu.dynamic_rotate %217 by %c16_i32_106 dim 1 : vector<4x256xf32>, i32 -> vector<4x256xf32>
    %222 = vector.broadcast %7 : vector<1x256xf32> to vector<4x256xf32>
    %223 = arith.mulf %221, %222 : vector<4x256xf32>
    %c15_i32_107 = arith.constant 15 : i32
    %224 = tpu.dynamic_rotate %217 by %c15_i32_107 dim 1 : vector<4x256xf32>, i32 -> vector<4x256xf32>
    %225 = vector.broadcast %9 : vector<1x256xf32> to vector<4x256xf32>
    %226 = arith.mulf %224, %225 : vector<4x256xf32>
    %c1_i32_108 = arith.constant 1 : i32
    %227 = tpu.dynamic_rotate %217 by %c1_i32_108 dim 1 : vector<4x256xf32>, i32 -> vector<4x256xf32>
    %228 = vector.broadcast %11 : vector<1x256xf32> to vector<4x256xf32>
    %229 = arith.mulf %227, %228 : vector<4x256xf32>
    %230 = vector.broadcast %13 : vector<1x256xf32> to vector<4x256xf32>
    %231 = arith.mulf %217, %230 : vector<4x256xf32>
    %c255_i32_109 = arith.constant 255 : i32
    %232 = tpu.dynamic_rotate %217 by %c255_i32_109 dim 1 : vector<4x256xf32>, i32 -> vector<4x256xf32>
    %233 = vector.broadcast %15 : vector<1x256xf32> to vector<4x256xf32>
    %234 = arith.mulf %232, %233 : vector<4x256xf32>
    %c241_i32_110 = arith.constant 241 : i32
    %235 = tpu.dynamic_rotate %217 by %c241_i32_110 dim 1 : vector<4x256xf32>, i32 -> vector<4x256xf32>
    %236 = vector.broadcast %17 : vector<1x256xf32> to vector<4x256xf32>
    %237 = arith.mulf %235, %236 : vector<4x256xf32>
    %c240_i32_111 = arith.constant 240 : i32
    %238 = tpu.dynamic_rotate %217 by %c240_i32_111 dim 1 : vector<4x256xf32>, i32 -> vector<4x256xf32>
    %239 = vector.broadcast %19 : vector<1x256xf32> to vector<4x256xf32>
    %240 = arith.mulf %238, %239 : vector<4x256xf32>
    %c239_i32_112 = arith.constant 239 : i32
    %241 = tpu.dynamic_rotate %217 by %c239_i32_112 dim 1 : vector<4x256xf32>, i32 -> vector<4x256xf32>
    %242 = vector.broadcast %21 : vector<1x256xf32> to vector<4x256xf32>
    %243 = arith.mulf %241, %242 : vector<4x256xf32>
    %244 = tpu.concatenate %220, %223, %226, %229, %231, %234, %237, %240, %243 in 0 : vector<4x256xf32>, vector<4x256xf32>, vector<4x256xf32>, vector<4x256xf32>, vector<4x256xf32>, vector<4x256xf32>, vector<4x256xf32>, vector<4x256xf32>, vector<4x256xf32> -> vector<36x256xf32>
    %c0_113 = arith.constant 0 : index
    %c0_114 = arith.constant 0 : index
    %245 = vector.load %arg9[%c0_113, %c0_114] : memref<4x36xf32, #tpu.memory_space<vmem>>, vector<4x36xf32>
    %cst_115 = arith.constant dense<0.000000e+00> : vector<4x256xf32>
    %246 = tpu.matmul %245, %244, %cst_115 {dimension_numbers = #tpu.dot_dimension_numbers<[1], [0], [0], [1], [0, 0, 1, 1], [], []>} : vector<4x36xf32>, vector<36x256xf32>, vector<4x256xf32> -> vector<4x256xf32>
    %c5_116 = arith.constant 5 : index
    %c0_117 = arith.constant 0 : index
    %c0_118 = arith.constant 0 : index
    %247 = vector.load %arg10[%c5_116, %c0_117, %c0_118] : memref<6x4x1xf32, #tpu.memory_space<vmem>>, vector<1x4x1xf32>
    %248 = vector.shape_cast %247 : vector<1x4x1xf32> to vector<4x1xf32>
    %249 = vector.broadcast %248 : vector<4x1xf32> to vector<4x256xf32>
    %250 = arith.mulf %246, %249 : vector<4x256xf32>
    %c5_119 = arith.constant 5 : index
    %c0_120 = arith.constant 0 : index
    %c0_121 = arith.constant 0 : index
    %251 = vector.load %arg11[%c5_119, %c0_120, %c0_121] : memref<6x4x1xf32, #tpu.memory_space<vmem>>, vector<1x4x1xf32>
    %252 = vector.shape_cast %251 : vector<1x4x1xf32> to vector<4x1xf32>
    %253 = vector.broadcast %252 : vector<4x1xf32> to vector<4x256xf32>
    %254 = arith.addf %250, %253 : vector<4x256xf32>
    %255 = arith.negf %254 : vector<4x256xf32>
    %256 = math.exp %255 : vector<4x256xf32>
    %cst_122 = arith.constant 1.000000e+00 : f32
    %257 = vector.broadcast %cst_122 : f32 to vector<4x256xf32>
    %258 = arith.addf %257, %256 : vector<4x256xf32>
    %259 = arith.divf %257, %258 : vector<4x256xf32>
    %260 = arith.mulf %139, %259 : vector<4x256xf32>
    %261 = arith.addf %1, %260 : vector<4x256xf32>
    %c0_123 = arith.constant 0 : index
    %c0_124 = arith.constant 0 : index
    %c0_125 = arith.constant 0 : index
    %262 = vector.load %arg12[%c0_123, %c0_124, %c0_125] : memref<1x4x256xf32, #tpu.memory_space<vmem>>, vector<1x4x256xf32>
    %263 = vector.shape_cast %262 : vector<1x4x256xf32> to vector<4x256xf32>
    %264 = vector.shape_cast %261 : vector<4x256xf32> to vector<1x4x256xf32>
    tpu.vector_store %arg12[%c0_123, %c0_124, %c0_125], %264 {strides = array<i32>} : memref<1x4x256xf32, #tpu.memory_space<vmem>>, vector<1x4x256xf32>,
    %265 = arith.addf %3, %217 : vector<4x256xf32>
    %c0_126 = arith.constant 0 : index
    %c0_127 = arith.constant 0 : index
    %c0_128 = arith.constant 0 : index
    %266 = vector.load %arg13[%c0_126, %c0_127, %c0_128] : memref<1x4x256xf32, #tpu.memory_space<vmem>>, vector<1x4x256xf32>
    %267 = vector.shape_cast %266 : vector<1x4x256xf32> to vector<4x256xf32>
    %268 = vector.shape_cast %265 : vector<4x256xf32> to vector<1x4x256xf32>
    tpu.vector_store %arg13[%c0_126, %c0_127, %c0_128], %268 {strides = array<i32>} : memref<1x4x256xf32, #tpu.memory_space<vmem>>, vector<1x4x256xf32>,
    return
  }
  func.func @transform_0(%arg0: i32) -> (i32, i32, i32) {
    %c0_i32 = arith.constant 0 : i32
    %c0_i32_0 = arith.constant 0 : i32
    %c0_i32_1 = arith.constant 0 : i32
    return %arg0, %c0_i32, %c0_i32_0 : i32, i32, i32
  }
  func.func @transform_1(%arg0: i32) -> (i32, i32, i32) {
    %c0_i32 = arith.constant 0 : i32
    %c0_i32_0 = arith.constant 0 : i32
    %c0_i32_1 = arith.constant 0 : i32
    return %arg0, %c0_i32, %c0_i32_0 : i32, i32, i32
  }
  func.func @transform_2(%arg0: i32) -> (i32, i32, i32) {
    %c0_i32 = arith.constant 0 : i32
    %c0_i32_0 = arith.constant 0 : i32
    %c0_i32_1 = arith.constant 0 : i32
    %c0_i32_2 = arith.constant 0 : i32
    return %c0_i32, %c0_i32_0, %c0_i32_1 : i32, i32, i32
  }
  func.func @transform_3(%arg0: i32) -> (i32, i32) {
    %c0_i32 = arith.constant 0 : i32
    %c0_i32_0 = arith.constant 0 : i32
    %c0_i32_1 = arith.constant 0 : i32
    return %c0_i32, %c0_i32_0 : i32, i32
  }
  func.func @transform_4(%arg0: i32) -> (i32, i32) {
    %c0_i32 = arith.constant 0 : i32
    %c0_i32_0 = arith.constant 0 : i32
    %c0_i32_1 = arith.constant 0 : i32
    return %c0_i32, %c0_i32_0 : i32, i32
  }
  func.func @transform_5(%arg0: i32) -> (i32, i32) {
    %c0_i32 = arith.constant 0 : i32
    %c0_i32_0 = arith.constant 0 : i32
    %c0_i32_1 = arith.constant 0 : i32
    return %c0_i32, %c0_i32_0 : i32, i32
  }
  func.func @transform_6(%arg0: i32) -> (i32, i32) {
    %c0_i32 = arith.constant 0 : i32
    %c0_i32_0 = arith.constant 0 : i32
    %c0_i32_1 = arith.constant 0 : i32
    return %c0_i32, %c0_i32_0 : i32, i32
  }
  func.func @transform_7(%arg0: i32) -> (i32, i32) {
    %c0_i32 = arith.constant 0 : i32
    %c0_i32_0 = arith.constant 0 : i32
    %c0_i32_1 = arith.constant 0 : i32
    return %c0_i32, %c0_i32_0 : i32, i32
  }
  func.func @transform_8(%arg0: i32) -> (i32, i32) {
    %c0_i32 = arith.constant 0 : i32
    %c0_i32_0 = arith.constant 0 : i32
    %c0_i32_1 = arith.constant 0 : i32
    return %c0_i32, %c0_i32_0 : i32, i32
  }
  func.func @transform_9(%arg0: i32) -> (i32, i32, i32) {
    %c0_i32 = arith.constant 0 : i32
    %c0_i32_0 = arith.constant 0 : i32
    %c0_i32_1 = arith.constant 0 : i32
    %c0_i32_2 = arith.constant 0 : i32
    return %c0_i32, %c0_i32_0, %c0_i32_1 : i32, i32, i32
  }
  func.func @transform_10(%arg0: i32) -> (i32, i32, i32) {
    %c0_i32 = arith.constant 0 : i32
    %c0_i32_0 = arith.constant 0 : i32
    %c0_i32_1 = arith.constant 0 : i32
    %c0_i32_2 = arith.constant 0 : i32
    return %c0_i32, %c0_i32_0, %c0_i32_1 : i32, i32, i32
  }
  func.func @transform_11(%arg0: i32) -> (i32, i32, i32) {
    %c0_i32 = arith.constant 0 : i32
    %c0_i32_0 = arith.constant 0 : i32
    %c0_i32_1 = arith.constant 0 : i32
    return %arg0, %c0_i32, %c0_i32_0 : i32, i32, i32
  }
  func.func @transform_12(%arg0: i32) -> (i32, i32, i32) {
    %c0_i32 = arith.constant 0 : i32
    %c0_i32_0 = arith.constant 0 : i32
    %c0_i32_1 = arith.constant 0 : i32
    return %arg0, %c0_i32, %c0_i32_0 : i32, i32, i32
  }
}

</mosaic_0001>

<bundles_post_ra>
// kernel: cfm_resblock.1
= control target key start
LH: loop header
LB: loop body
LE: loop exit
PB: predicated region body
PF: predicated region fallthrough
CT: control target
= control target key end

     0   :  { %s1878_s21 = smov 0   ;;  %s2631_s0 = inlined_call_operand.vmem [shape: f32[2,4,256], index: 0, kind: input, shape index: {}]   ;;  %s2632_s1 = inlined_call_operand.vmem [shape: f32[2,4,256], index: 1, kind: input, shape index: {}]   ;;  %s2633_s2 = inlined_call_operand.vmem [shape: f32[9,1,256], index: 2, kind: input, shape index: {}]   ;;  %s2634_s3 = inlined_call_operand.vmem [shape: f32[4,72], index: 3, kind: input, shape index: {}]   ;;  %s2635_s4 = inlined_call_operand.vmem [shape: f32[4,36], index: 4, kind: input, shape index: {}]   ;;  %s2636_s5 = inlined_call_operand.vmem [shape: f32[4,36], index: 5, kind: input, shape index: {}]   ;;  %s2637_s6 = inlined_call_operand.vmem [shape: f32[4,36], index: 6, kind: input, shape index: {}]   ;;  %s2638_s7 = inlined_call_operand.vmem [shape: f32[4,36], index: 7, kind: input, shape index: {}]   ;;  %s2639_s8 = inlined_call_operand.vmem [shape: f32[4,36], index: 8, kind: input, shape index: {}]   ;;  %s2640_s9 = inlined_call_operand.vmem [shape: f32[6,4,1], index: 9, kind: input, shape index: {}]   ;;  %s2641_s10 = inlined_call_operand.vmem [shape: f32[6,4,1], index: 10, kind: input, shape index: {}]   ;;  %s2642_s11 = inlined_call_operand.vmem [shape: f32[2,4,256], index: 11, kind: output, shape index: {0}]   ;;  %s2643_s12 = inlined_call_operand.vmem [shape: f32[2,4,256], index: 12, kind: output, shape index: {1}]  }
   0x1 LB: > { %s1707_s22 = sadd.s32 4294967295, %s1802_s21   ;;  %p1711_p0 = scmp.ge.s32.totalorder %s1802_s21, 1  ;;  %s1802_s21 = sphi %s1878_s21, %s23_s21  }
   0x2   : > { %p375_p1 = scmp.lt.s32.totalorder %s1802_s21, 3 }
   0x4   : > { %p376_p2 = pnand %p1711_p0, %p375_p1 }
   0x5   : > { %p427_p3 = scmp.lt.s32.totalorder (!%p376_p2), %s1707_s22, 1  ;;  %s1804_s30 = smov (!%p376_p2), 112  }
   0x6   : > { %379 = sbr.rel (%p376_p2) target bundleno = 1230 (0x4ce), region = 64  ;;  %s1805_s13 = smov (!%p376_p2), 111  }
   0x7   : > { %s1806_s14 = smov (!%p376_p2), 113   ;;  %s1807_s15 = smov (!%p376_p2), 127  }
   0x8   : > { %s1808_s16 = smov (!%p376_p2), 1   ;;  %s1809_s17 = smov (!%p376_p2), 15  }
   0x9   : > { %s1810_s18 = smov (!%p376_p2), 16   ;;  %s1811_s19 = smov (!%p376_p2), 17  }
   0xb   : > { %s2645_s22 = smov (!%p427_p3, %s1707_s22), 1  ;;  %vm479_vm0 = vcmask 1043456   ;;  %v648_v14 = vld [vmem:[%s2640_s9] sm:$0xf]  ;;  %v1812_v15 = vmov 0   ;;  %v486_v21 = vlaneseq  ;;  %vm604_vm9 = vcmask 588800  }
   0xc   : > { %s1886_s23 = sshll.u32 %s2645_s22, 3  ;;  %1785 = vset.pattern.permute.xlu1 %v1812_v15  ;;  %1786 = vset.pattern.permute.xlu2 %v1812_v15  ;;  %v656_v24 = vld [vmem:[%s2641_s10] sm:$0xf]  ;;  %v1727_v28 = vld [vmem:[%s2633_s2 + $0x10] sm:$0x3]  ;;  %vm813_vm10 = vcmask 293888  }
   0xd   : > { %s431_s26 = scalar_lea.vmem %s2631_s0, %s1886_s23  ;;  %s436_s29 = scalar_lea.vmem %s2632_s1, %s1886_s23  ;;  %1787 = vset.pattern.permute.xlu0 %v1812_v15  ;;  %v1966_v25 = vand.u32 127, %v486_v21  ;;  %v1723_v29 = vld [vmem:[%s2633_s2 + $0x8] sm:$0x3]  ;;  %v1726_v31 = vld [vmem:[%s2633_s2 + $0xe] sm:$0x3]  ;;  %v1984_v33 = vperm.slane %v1727_v28, 0 }
   0xe   : > { %v1892_v0 = vld [vmem:[%s431_s26] sm:$0xff]  ;;  %v1725_v32 = vld [vmem:[%s2633_s2 + $0xc] sm:$0x3]  ;;  %v1986_v34 = vperm.slane %v1727_v28, 1  ;;  %v1988_v35 = vperm.slane %v1723_v29, 1  ;;  %v1992_v36 = vperm.slane %v1726_v31, 0  ;;  %s446_s28 = scalar_lea.vmem %s2643_s12, %s1886_s23  ;;  %s441_s25 = scalar_lea.vmem %s2642_s11, %s1886_s23 }
   0xf   : > { %467 = vst [vmem:[#allocation1] ss:$2 sm:$0xff] %v1892_v0  ;;  %v1899_v1 = vld [vmem:[%s436_s29] sm:$0xff]  ;;  %vm579_vm1 = vcmp.lt.s32.totalorder %v1966_v25, 112  ;;  %vm593_vm2 = vcmp.lt.s32.totalorder %v1966_v25, 111  ;;  %vm565_vm3 = vcmp.lt.s32.totalorder %v1966_v25, 113 }
  0x10   : > { %v1994_v37 = vperm.slane %v1726_v31, 1  ;;  %v1996_v40 = vperm.slane %v1725_v32, 0  ;;  %v1998_v41 = vperm.slane %v1725_v32, 1  ;;  %v2000_v42 = vperm.slane %v1723_v29, 0  ;;  %v1724_v54 = vld [vmem:[%s2633_s2 + $0xa] sm:$0x3] }
  0x11   : > { %v718_v43 = vrot.slane %v1988_v35, 4  ;;  %vm551_vm4 = vcmp.lt.s32.totalorder %v1966_v25, 127  ;;  %v2030_v61 = vperm.slane %v1724_v54, 0  ;;  %v2032_v62 = vperm.slane %v1724_v54, 1 }
  0x12   : > { %vm530_vm5 = vcmp.lt.s32.totalorder %v1966_v25, 1  ;;  %vm516_vm6 = vcmp.lt.s32.totalorder %v1966_v25, 15  ;;  %vm502_vm7 = vcmp.lt.s32.totalorder %v1966_v25, 16  ;;  %vm488_vm8 = vcmp.lt.s32.totalorder %v1966_v25, 17  ;;  %v1485_v25 = vld [vmem:[%s2639_s8] sm:$0xf] }
  0x13   : > { %v719_v58 = vsel %vm479_vm0, %v2000_v42, %v718_v43 }
  0x14   : > { %v721_v63 = vmul.f32 %v719_v58, %v1892_v0 }
  0x16   : > { %v468_v2 = vld.sshfl [vmem:[#allocation1] sm:$0xff pattern:$0x75316420]  ;;  %v469_v3 = vld.sshfl [vmem:[#allocation1 + $0x8] sm:$0xff pattern:$0x75316420] }
  0x17   : > { %474 = vst [vmem:[#allocation1 + $0x1] ss:$2 sm:$0xff] %v1899_v1 }
  0x1e   : > { %v475_v4 = vld.sshfl [vmem:[#allocation1] sm:$0xff pattern:$0x75316420]  ;;  %v476_v5 = vld.sshfl [vmem:[#allocation1 + $0x8] sm:$0xff pattern:$0x75316420] }
  0x1f   : > { %v1903_v6 = vsel %vm479_vm0, %v468_v2, %v475_v4  ;;  %666 = vst [vmem:[#allocation1] ss:$2 sm:$0xff] %v1892_v0  ;;  %v1913_v7 = vsel %vm479_vm0, %v469_v3, %v476_v5 }
  0x20   : > { %575 = vrot.lane.b32.xlu1 %v1903_v6, %s1804_s30  ;;  %589 = vrot.lane.b32.xlu0 %v1903_v6, %s1805_s13  ;;  %v545_v15 = vmul.f32 %v2000_v42, %v1903_v6 }
  0x21   : > { %561 = vrot.lane.b32.xlu2 %v1903_v6, %s1806_s14 }
  0x26   : > { %v1915_v8 = vld.sshfl [vmem:[#allocation1] sm:$0xff pattern:$0x75316420]  ;;  %v1917_v9 = vld.sshfl [vmem:[#allocation1 + $0x8] sm:$0xff pattern:$0x75316420] }
  0x27   : > { %679 = vst [vmem:[#allocation1] ss:$2 sm:$0xff] %v1892_v0 }
  0x28   : > { %577 = vrot.lane.b32.xlu1 %v1913_v7, %s1804_s30  ;;  %591 = vrot.lane.b32.xlu0 %v1913_v7, %s1805_s13 }
  0x29   : > { %563 = vrot.lane.b32.xlu2 %v1913_v7, %s1806_s14 }
  0x2e   : > { %v680_v10 = vld.sshfl [vmem:[#allocation1] sm:$0xff pattern:$0x75316420]  ;;  %v1926_v11 = vld.sshfl [vmem:[#allocation1 + $0x8] sm:$0xff pattern:$0x75316420] }
  0x2f   : > { %692 = vst [vmem:[#allocation1] ss:$2 sm:$0xff] %v1892_v0 }
  0x30   : > { %549 = vrot.lane.b32.xlu1 %v1913_v7, %s1807_s15  ;;  %547 = vrot.lane.b32.xlu0 %v1903_v6, %s1807_s15 }
  0x31   : > { %526 = vrot.lane.b32.xlu2 %v1903_v6, %s1808_s16 }
  0x36   : > { %v693_v12 = vld.sshfl [vmem:[#allocation1] sm:$0xff pattern:$0x75316420]  ;;  %v1949_v13 = vld.sshfl [vmem:[#allocation1 + $0x8] sm:$0xff pattern:$0x75316420] }
  0x37   : > { %705 = vst [vmem:[#allocation1] ss:$2 sm:$0xff] %v1892_v0 }
  0x38   : > { %512 = vrot.lane.b32.xlu1 %v1903_v6, %s1809_s17  ;;  %528 = vrot.lane.b32.xlu0 %v1913_v7, %s1808_s16 }
  0x39   : > { %514 = vrot.lane.b32.xlu2 %v1913_v7, %s1809_s17 }
  0x3e   : > { %v706_v16 = vld.sshfl [vmem:[#allocation1] sm:$0xff pattern:$0x75316420]  ;;  %v707_v17 = vld.sshfl [vmem:[#allocation1 + $0x8] sm:$0xff pattern:$0x75316420] }
  0x3f   : > { %722 = vst [vmem:[#allocation1] ss:$2 sm:$0xff] %v1892_v0 }
  0x40   : > { %500 = vrot.lane.b32.xlu1 %v1913_v7, %s1810_s18  ;;  %498 = vrot.lane.b32.xlu0 %v1903_v6, %s1810_s18 }
  0x41   : > { %482 = vrot.lane.b32.xlu2 %v1903_v6, %s1811_s19 }
  0x46   : > { %v723_v19 = vld.sshfl [vmem:[#allocation1] sm:$0xff pattern:$0x75316420]  ;;  %v1958_v20 = vld.sshfl [vmem:[#allocation1 + $0x8] sm:$0xff pattern:$0x75316420] }
  0x47   : > { %735 = vst [vmem:[#allocation1] ss:$2 sm:$0xff] %v1892_v0 }
  0x48   : > { %484 = vrot.lane.b32.xlu0 %v1913_v7, %s1811_s19  ;;  %651 = vperm.xlu1 %1785, %v648_v14  }
  0x49   : > { %659 = vperm.xlu2 %1786, %v656_v24  }
  0x4e   : > { %v736_v26 = vld.sshfl [vmem:[#allocation1] sm:$0xff pattern:$0x75316420]  ;;  %v737_v27 = vld.sshfl [vmem:[#allocation1 + $0x8] sm:$0xff pattern:$0x75316420] }
  0x4f   : > { %748 = vst [vmem:[#allocation1] ss:$2 sm:$0xff] %v1892_v0 }
  0x50   : > { %712 = vrot.lane.b32.xlu0 %v707_v17, %s1808_s16  ;;  %684 = vrot.lane.b32.xlu1 %v680_v10, %s1810_s18  ;;  %v1722_v10 = vld [vmem:[%s2633_s2 + $0x6] sm:$0x3] }
  0x51   : > { %710 = vrot.lane.b32.xlu2 %v706_v16, %s1808_s16  ;;  %v546_v16 = vmul.f32 %v1988_v35, %v1913_v7  ;;  %v2058_v6 = vperm.slane %v1722_v10, 1 }
  0x56   : > { %v749_v50 = vld.sshfl [vmem:[#allocation1] sm:$0xff pattern:$0x75316420]  ;;  %v750_v51 = vld.sshfl [vmem:[#allocation1 + $0x8] sm:$0xff pattern:$0x75316420] }
  0x57   : > { %761 = vst [vmem:[#allocation1] ss:$2 sm:$0xff] %v1892_v0 }
  0x58   : > { %697 = vrot.lane.b32.xlu0 %v693_v12, %s1809_s17  ;;  %727 = vrot.lane.b32.xlu1 %v723_v19, %s1807_s15  ;;  %v1721_v19 = vld [vmem:[%s2633_s2 + $0x4] sm:$0x3] }
  0x59   : > { %729 = vrot.lane.b32.xlu2 %v1958_v20, %s1807_s15  ;;  %v2056_v20 = vperm.slane %v1722_v10, 0  ;;  %v2061_v21 = vperm.slane %v1721_v19, 0 }
  0x5e   : > { %v763_v17 = vld.sshfl [vmem:[#allocation1 + $0x8] sm:$0xff pattern:$0x75316420] }
  0x60   : > { %740 = vrot.lane.b32.xlu0 %v736_v26, %s1806_s14  ;;  %742 = vrot.lane.b32.xlu1 %v737_v27, %s1806_s14 }
  0x61   : > { %686 = vrot.lane.b32.xlu2 %v1926_v11, %s1810_s18 }
  0x68   : > { %753 = vrot.lane.b32.xlu0 %v749_v50, %s1804_s30  ;;  %755 = vrot.lane.b32.xlu1 %v750_v51, %s1804_s30 }
  0x69   : > { %671 = vrot.lane.b32.xlu2 %v1915_v8, %s1811_s19 }
  0x70   : > { %768 = vrot.lane.b32.xlu0 %v763_v17, %s1805_s13  ;;  %699 = vrot.lane.b32.xlu1 %v1949_v13, %s1809_s17 }
  0x78   : > { %673 = vrot.lane.b32.xlu0 %v1917_v9, %s1811_s19 }
  0x7b   : > { %v562_v18 = vpop.permute.xlu2 %561 }
  0x83   : > { %v564_v30 = vpop.permute.xlu2 %563 }
  0x84   : > { %v566_v52 = vsel %vm565_vm3, %v562_v18, %v564_v30  ;;  %v567_v53 = vsel %vm565_vm3, %v564_v30, %v562_v18  ;;  %v762_v18 = vld.sshfl [vmem:[#allocation1] sm:$0xff pattern:$0x75316420] }
  0x85   : > { %v573_v59 = vmul.f32 %v1996_v40, %v566_v52  ;;  %v574_v60 = vmul.f32 %v1998_v41, %v567_v53  ;;  %787 = vst [vmem:[#allocation1] ss:$2 sm:$0xff] %v721_v63  ;;  %766 = vrot.lane.b32.xlu2 %v762_v18, %s1805_s13 }
  0x8b   : > { %v527_v57 = vpop.permute.xlu2 %526 }
  0x92   : > { %v576_v22 = vpop.permute.xlu1 %575  ;;  %v590_v23 = vpop.permute.xlu0 %589 }
  0x93   : > { %v515_v7 = vpop.permute.xlu2 %514 }
  0x9a   : > { %v578_v38 = vpop.permute.xlu1 %577  ;;  %v592_v39 = vpop.permute.xlu0 %591 }
  0x9b   : > { %v580_v44 = vsel %vm579_vm1, %v576_v22, %v578_v38  ;;  %v581_v45 = vsel %vm579_vm1, %v578_v38, %v576_v22  ;;  %v594_v46 = vsel %vm593_vm2, %v590_v23, %v592_v39  ;;  %v595_v47 = vsel %vm593_vm2, %v592_v39, %v590_v23  ;;  %v1720_v38 = vld [vmem:[%s2633_s2 + $0x2] sm:$0x3] }
  0x9c   : > { %v601_v48 = vmul.f32 %v1984_v33, %v594_v46  ;;  %v602_v49 = vmul.f32 %v1986_v34, %v595_v47  ;;  %v587_v55 = vmul.f32 %v1992_v36, %v580_v44  ;;  %v588_v56 = vmul.f32 %v1994_v37, %v581_v45 }
  0x9d   : > { %v2063_v22 = vperm.slane %v1721_v19, 1  ;;  %v2087_v11 = vperm.slane %v1720_v38, 0  ;;  %v2089_v39 = vperm.slane %v1720_v38, 1 }
  0x9e   : > { %615 = vmatpush.msra.mxu0 %v601_v48  ;;  %635 = vmatpush.msra.mxu1 %v602_v49  ;;  %v449_v48 = vld [vmem:[%s2633_s2] sm:$0x3]  ;;  %v483_v49 = vpop.permute.xlu2 %482 }
  0x9f   : > { %v2103_v50 = vperm.slane %v449_v48, 0  ;;  %v2105_v51 = vperm.slane %v449_v48, 1 }
  0xa0   : > { %616 = vmatpush.msra.mxu0 %v587_v55  ;;  %636 = vmatpush.msra.mxu1 %v588_v56  ;;  %v603_v56 = vld [vmem:[%s2634_s3] sm:$0xf] }
  0xa2   : > { %v550_v2 = vpop.permute.xlu1 %549  ;;  %617 = vmatpush.msra.mxu0 %v573_v59  ;;  %637 = vmatpush.msra.mxu1 %v574_v60  ;;  %v548_v3 = vpop.permute.xlu0 %547 }
  0xa3   : > { %v552_v4 = vsel %vm551_vm4, %v548_v3, %v550_v2  ;;  %v553_v5 = vsel %vm551_vm4, %v550_v2, %v548_v3 }
  0xa4   : > { %v559_v12 = vmul.f32 %v2030_v61, %v552_v4  ;;  %v560_v14 = vmul.f32 %v2032_v62, %v553_v5 }
  0xa6   : > { %618 = vmatpush.msra.mxu0 %v559_v12  ;;  %638 = vmatpush.msra.mxu1 %v560_v14 }
  0xa8   : > { %619 = vmatpush.msra.mxu0 %v545_v15  ;;  %639 = vmatpush.msra.mxu1 %v546_v16 }
  0xaa   : > { %v513_v23 = vpop.permute.xlu1 %512  ;;  %v529_v24 = vpop.permute.xlu0 %528 }
  0xab   : > { %v531_v26 = vsel %vm530_vm5, %v527_v57, %v529_v24  ;;  %v532_v27 = vsel %vm530_vm5, %v529_v24, %v527_v57  ;;  %v517_v28 = vsel %vm516_vm6, %v513_v23, %v515_v7  ;;  %v518_v29 = vsel %vm516_vm6, %v515_v7, %v513_v23  ;;  %v2117_v57 = vpop.permute.xlu2 %659 }
  0xac   : > { %v538_v30 = vmul.f32 %v2056_v20, %v532_v27  ;;  %v539_v13 = vmul.f32 %v2058_v6, %v531_v26  ;;  %v524_v31 = vmul.f32 %v2061_v21, %v518_v29  ;;  %v525_v32 = vmul.f32 %v2063_v22, %v517_v28 }
  0xae   : > { %620 = vmatpush.msra.mxu0 %v538_v30  ;;  %640 = vmatpush.msra.mxu1 %v539_v13 }
  0xb0   : > { %621 = vmatpush.msra.mxu0 %v524_v31  ;;  %641 = vmatpush.msra.mxu1 %v525_v32 }
  0xb2   : > { %v501_v43 = vpop.permute.xlu1 %500  ;;  %v499_v44 = vpop.permute.xlu0 %498 }
  0xb3   : > { %v503_v45 = vsel %vm502_vm7, %v499_v44, %v501_v43  ;;  %v504_v46 = vsel %vm502_vm7, %v501_v43, %v499_v44  ;;  %v711_v59 = vpop.permute.xlu2 %710 }
  0xb4   : > { %v510_v9 = vmul.f32 %v2087_v11, %v504_v46  ;;  %v511_v47 = vmul.f32 %v2089_v39, %v503_v45 }
  0xb6   : > { %622 = vmatpush.msra.mxu0 %v510_v9  ;;  %642 = vmatpush.msra.mxu1 %v511_v47 }
  0xba   : > { %v485_v52 = vpop.permute.xlu0 %484  ;;  %v2119_v58 = vpop.permute.xlu1 %651 }
  0xbb   : > { %v489_v8 = vsel %vm488_vm8, %v483_v49, %v485_v52  ;;  %v490_v53 = vsel %vm488_vm8, %v485_v52, %v483_v49  ;;  %v730_v2 = vpop.permute.xlu2 %729 }
  0xbc   : > { %v496_v54 = vmul.f32 %v2103_v50, %v490_v53  ;;  %v497_v55 = vmul.f32 %v2105_v51, %v489_v8 }
  0xbe   : > { %623 = vmatpush.msra.mxu0 %v496_v54  ;;  %643 = vmatpush.msra.mxu1 %v497_v55 }
  0xbf   : > { %1728 = vmatmul.msk.f32.vlgmr.msra.gmra.mxu0 %vm604_vm9, %v603_v56  ;;  %1729 = vmatmul.msk.f32.vlgmr.msra.gmra.mxu1 %vm604_vm9, %v603_v56 }
  0xc2   : > { %v713_v60 = vpop.permute.xlu0 %712  ;;  %v685_v63 = vpop.permute.xlu1 %684 }
  0xc3   : > { %v687_v5 = vpop.permute.xlu2 %686  ;;  %v714_v18 = vsel %vm530_vm5, %v711_v59, %v713_v60  ;;  %v715_v19 = vsel %vm530_vm5, %v713_v60, %v711_v59 }
  0xc4   : > { %v716_v32 = vmul.f32 %v715_v19, %v2056_v20  ;;  %v717_v38 = vmul.f32 %v714_v18, %v2058_v6  ;;  %v688_v49 = vsel %vm502_vm7, %v685_v63, %v687_v5  ;;  %v689_v52 = vsel %vm502_vm7, %v687_v5, %v685_v63 }
  0xc5   : > { %v691_v63 = vmul.f32 %v688_v49, %v2089_v39  ;;  %v1747_v49 = vld [vmem:[%s2641_s10 + $0xc] sm:$0xf] }
  0xc6   : > { %v782_v56 = vrot.slane %v716_v32, 4  ;;  %v783_v59 = vrot.slane %v717_v38, 4 }
  0xca   : > { %v698_v3 = vpop.permute.xlu0 %697  ;;  %v728_v4 = vpop.permute.xlu1 %727 }
  0xcb   : > { %v672_v14 = vpop.permute.xlu2 %671  ;;  %v731_v16 = vsel %vm551_vm4, %v728_v4, %v730_v2  ;;  %v732_v17 = vsel %vm551_vm4, %v730_v2, %v728_v4  ;;  %v690_v4 = vmul.f32 %v689_v52, %v2087_v11  ;;  %v1746_v52 = vld [vmem:[%s2640_s9 + $0xc] sm:$0xf] }
  0xcc   : > { %v733_v7 = vmul.f32 %v731_v16, %v2030_v61  ;;  %v734_v23 = vmul.f32 %v732_v17, %v2032_v62 }
  0xce   : > { %v794_v45 = vrot.slane %v733_v7, 4  ;;  %v795_v46 = vrot.slane %v734_v23, 4  ;;  %v776_v23 = vrot.slane %v690_v4, 4 }
  0xd2   : > { %v741_v10 = vpop.permute.xlu0 %740  ;;  %v743_v12 = vpop.permute.xlu1 %742 }
  0xd3   : > { %v744_v24 = vsel %vm565_vm3, %v741_v10, %v743_v12  ;;  %v745_v26 = vsel %vm565_vm3, %v743_v12, %v741_v10  ;;  %v788_v10 = vld.sshfl [vmem:[#allocation1] sm:$0xff pattern:$0x75316420]  ;;  %v789_v12 = vld.sshfl [vmem:[#allocation1 + $0x8] sm:$0xff pattern:$0x75316420] }
  0xd4   : > { %v746_v43 = vmul.f32 %v744_v24, %v1996_v40  ;;  %v747_v44 = vmul.f32 %v745_v26, %v1998_v41  ;;  %v808_v17 = vsel %vm479_vm0, %v788_v10, %v794_v45  ;;  %v809_v18 = vsel %vm479_vm0, %v789_v12, %v795_v46 }
  0xd5   : > { %v777_v24 = vrot.slane %v691_v63, 4 }
  0xda   : > { %v754_v15 = vpop.permute.xlu0 %753  ;;  %v756_v27 = vpop.permute.xlu1 %755 }
  0xdb   : > { %v757_v28 = vsel %vm579_vm1, %v754_v15, %v756_v27  ;;  %v758_v29 = vsel %vm579_vm1, %v756_v27, %v754_v15 }
  0xdc   : > { %v759_v30 = vmul.f32 %v757_v28, %v1992_v36  ;;  %v760_v13 = vmul.f32 %v758_v29, %v1994_v37 }
  0xde   : > { %v800_v9 = vrot.slane %v759_v30, 4  ;;  %v801_v47 = vrot.slane %v760_v13, 4 }
  0xdf   : > { %v767_v31 = vpop.permute.xlu2 %766 }
  0xe0   : > { %v810_v60 = vsel %vm479_vm0, %v746_v43, %v800_v9  ;;  %v811_v2 = vsel %vm479_vm0, %v747_v44, %v801_v47 }
  0xe2   : > { %v769_v48 = vpop.permute.xlu0 %768  ;;  %v700_v5 = vpop.permute.xlu1 %699 }
  0xe3   : > { %v770_v8 = vsel %vm593_vm2, %v767_v31, %v769_v48  ;;  %v771_v53 = vsel %vm593_vm2, %v769_v48, %v767_v31  ;;  %v701_v15 = vsel %vm516_vm6, %v698_v3, %v700_v5  ;;  %v702_v16 = vsel %vm516_vm6, %v700_v5, %v698_v3  ;;  %v812_v31 = vld [vmem:[%s2635_s4] sm:$0xf] }
  0xe4   : > { %v772_v54 = vmul.f32 %v770_v8, %v1984_v33  ;;  %v773_v55 = vmul.f32 %v771_v53, %v1986_v34  ;;  %v703_v19 = vmul.f32 %v702_v16, %v2061_v21  ;;  %v704_v7 = vmul.f32 %v701_v15, %v2063_v22 }
  0xe6   : > { %1730 = vmatpush.msk.msra.mxu2 %vm479_vm0, %v772_v54  ;;  %1732 = vmatpush.msk.msra.mxu3 %vm479_vm0, %v773_v55  ;;  %v806_v27 = vsel %vm479_vm0, %v703_v19, %v782_v56  ;;  %v807_v28 = vsel %vm479_vm0, %v704_v7, %v783_v59 }
  0xe8   : > { %835 = vmatpush.msra.mxu2 %v810_v60  ;;  %855 = vmatpush.msra.mxu3 %v811_v2 }
  0xea   : > { %v674_v26 = vpop.permute.xlu0 %673  ;;  %836 = vmatpush.msra.mxu2 %v808_v17  ;;  %856 = vmatpush.msra.mxu3 %v809_v18 }
  0xeb   : > { %v675_v3 = vsel %vm488_vm8, %v672_v14, %v674_v26  ;;  %v676_v29 = vsel %vm488_vm8, %v674_v26, %v672_v14 }
  0xec   : > { %v677_v30 = vmul.f32 %v676_v29, %v2103_v50  ;;  %v678_v13 = vmul.f32 %v675_v3, %v2105_v51  ;;  %837 = vmatpush.msra.mxu2 %v806_v27  ;;  %857 = vmatpush.msra.mxu3 %v807_v28 }
  0xee   : > { %v804_v32 = vsel %vm479_vm0, %v677_v30, %v776_v23  ;;  %v805_v38 = vsel %vm479_vm0, %v678_v13, %v777_v24 }
  0xef   : > { %838 = vmatpush.msra.mxu2 %v804_v32  ;;  %858 = vmatpush.msra.mxu3 %v805_v38 }
  0xf0   : > { %1731 = vmatmul.msk.f32.vlgmr.msra.gmra.mxu2 %vm813_vm10, %v812_v31  ;;  %1733 = vmatmul.msk.f32.vlgmr.msra.gmra.mxu3 %vm813_vm10, %v812_v31 }
 0x13c   : > { %v645_v14 = vpop.f32.mrf.mxu1  ;;  %v625_v43 = vpop.f32.mrf.mxu0 }
 0x13d   : > { %v655_v44 = vmul.f32 %v2119_v58, %v645_v14  ;;  %v654_v45 = vmul.f32 %v2119_v58, %v625_v43  ;;  %v1735_v58 = vld [vmem:[%s2641_s10 + $0x4] sm:$0xf] }
 0x13f   : > { %v663_v46 = vadd.f32 %v2117_v57, %v655_v44  ;;  %v662_v9 = vadd.f32 %v2117_v57, %v654_v45  ;;  %v1734_v57 = vld [vmem:[%s2640_s9 + $0x4] sm:$0xf] }
 0x141   : > { %v665_v47 = vmax.f32 %v663_v46, 0.0  ;;  %v664_v48 = vmax.f32 %v662_v9, 0.0 }
 0x143   : > { %1103 = vrot.lane.b32.xlu2 %v665_v47, %s1804_s30  ;;  %1109 = vrot.lane.b32.xlu0 %v664_v48, %s1805_s13  ;;  %v1083_v43 = vmul.f32 %v664_v48, %v2000_v42  ;;  %v1084_v44 = vmul.f32 %v665_v47, %v1988_v35 }
 0x144   : > { %1101 = vrot.lane.b32.xlu1 %v664_v48, %s1804_s30 }
 0x14b   : > { %1085 = vrot.lane.b32.xlu2 %v664_v48, %s1807_s15  ;;  %1087 = vrot.lane.b32.xlu0 %v665_v47, %s1807_s15 }
 0x14c   : > { %1111 = vrot.lane.b32.xlu1 %v665_v47, %s1805_s13 }
 0x153   : > { %1095 = vrot.lane.b32.xlu2 %v665_v47, %s1806_s14  ;;  %1075 = vrot.lane.b32.xlu0 %v664_v48, %s1808_s16 }
 0x154   : > { %1093 = vrot.lane.b32.xlu1 %v664_v48, %s1806_s14 }
 0x15b   : > { %1059 = vrot.lane.b32.xlu2 %v664_v48, %s1810_s18  ;;  %1061 = vrot.lane.b32.xlu0 %v665_v47, %s1810_s18 }
 0x15c   : > { %1077 = vrot.lane.b32.xlu1 %v665_v47, %s1808_s16 }
 0x163   : > { %1069 = vrot.lane.b32.xlu2 %v665_v47, %s1809_s17  ;;  %1051 = vrot.lane.b32.xlu0 %v664_v48, %s1811_s19 }
 0x164   : > { %1067 = vrot.lane.b32.xlu1 %v664_v48, %s1809_s17 }
 0x16b   : > { %867 = vperm.xlu2 %1786, %v1734_v57   ;;  %876 = vperm.xlu0 %1787, %v1735_v58  }
 0x16c   : > { %1053 = vrot.lane.b32.xlu1 %v665_v47, %s1811_s19 }
 0x173   : > { %1212 = vperm.xlu2 %1786, %v1747_v49  }
 0x174   : > { %1203 = vperm.xlu1 %1785, %v1746_v52  }
 0x19d   : > { %v1104_v8 = vpop.permute.xlu2 %1103 }
 0x1a5   : > { %v1086_v53 = vpop.permute.xlu2 %1085 }
 0x1ad   : > { %v1096_v56 = vpop.permute.xlu2 %1095 }
 0x1b5   : > { %v1110_v54 = vpop.permute.xlu0 %1109  ;;  %v1060_v23 = vpop.permute.xlu2 %1059 }
 0x1b6   : > { %v1102_v55 = vpop.permute.xlu1 %1101 }
 0x1b7   : > { %v1105_v63 = vsel %vm579_vm1, %v1102_v55, %v1104_v8  ;;  %v1106_v5 = vsel %vm579_vm1, %v1104_v8, %v1102_v55 }
 0x1b8   : > { %v1107_v17 = vmul.f32 %v1105_v63, %v1992_v36  ;;  %v1108_v18 = vmul.f32 %v1106_v5, %v1994_v37 }
 0x1ba   : > { %v1137_v27 = vrot.slane %v1107_v17, 4  ;;  %v1138_v28 = vrot.slane %v1108_v18, 4 }
 0x1bd   : > { %v1088_v59 = vpop.permute.xlu0 %1087  ;;  %v1070_v58 = vpop.permute.xlu2 %1069 }
 0x1be   : > { %v1112_v60 = vpop.permute.xlu1 %1111  ;;  %v1089_v15 = vsel %vm551_vm4, %v1086_v53, %v1088_v59  ;;  %v1090_v16 = vsel %vm551_vm4, %v1088_v59, %v1086_v53 }
 0x1bf   : > { %v1113_v2 = vsel %vm593_vm2, %v1110_v54, %v1112_v60  ;;  %v1114_v4 = vsel %vm593_vm2, %v1112_v60, %v1110_v54  ;;  %v1091_v19 = vmul.f32 %v1089_v15, %v2030_v61  ;;  %v1092_v7 = vmul.f32 %v1090_v16, %v2032_v62  ;;  %v840_v60 = vpop.f32.mrf.mxu2 }
 0x1c0   : > { %v1115_v10 = vmul.f32 %v1113_v2, %v1984_v33  ;;  %v1116_v12 = vmul.f32 %v1114_v4, %v1986_v34 }
 0x1c1   : > { %v1131_v30 = vrot.slane %v1091_v19, 4  ;;  %v1132_v13 = vrot.slane %v1092_v7, 4 }
 0x1c2   : > { %1742 = vmatpush.msk.msrb.mxu0 %vm479_vm0, %v1115_v10  ;;  %1744 = vmatpush.msk.msrb.mxu1 %vm479_vm0, %v1116_v12  ;;  %v860_v10 = vpop.f32.mrf.mxu3 }
 0x1c3   : > { %v1145_v45 = vsel %vm479_vm0, %v1083_v43, %v1131_v30  ;;  %v1146_v46 = vsel %vm479_vm0, %v1084_v44, %v1132_v13 }
 0x1c5   : > { %v1076_v24 = vpop.permute.xlu0 %1075  ;;  %v868_v12 = vpop.permute.xlu2 %867 }
 0x1c6   : > { %v1094_v26 = vpop.permute.xlu1 %1093  ;;  %v870_v19 = vmul.f32 %v868_v12, %v840_v60  ;;  %v871_v7 = vmul.f32 %v868_v12, %v860_v10 }
 0x1c7   : > { %v1097_v3 = vsel %vm565_vm3, %v1094_v26, %v1096_v56  ;;  %v1098_v29 = vsel %vm565_vm3, %v1096_v56, %v1094_v26 }
 0x1c8   : > { %v1099_v31 = vmul.f32 %v1097_v3, %v1996_v40  ;;  %v1100_v32 = vmul.f32 %v1098_v29, %v1998_v41 }
 0x1ca   : > { %v1147_v38 = vsel %vm479_vm0, %v1099_v31, %v1137_v27  ;;  %v1148_v14 = vsel %vm479_vm0, %v1100_v32, %v1138_v28 }
 0x1cb   : > { %1171 = vmatpush.msrb.mxu0 %v1147_v38  ;;  %1191 = vmatpush.msrb.mxu1 %v1148_v14  ;;  %v1149_v14 = vld [vmem:[%s2637_s6] sm:$0xf] }
 0x1cd   : > { %1172 = vmatpush.msrb.mxu0 %v1145_v45  ;;  %1192 = vmatpush.msrb.mxu1 %v1146_v46  ;;  %v1062_v9 = vpop.permute.xlu0 %1061  ;;  %v1213_v45 = vpop.permute.xlu2 %1212 }
 0x1ce   : > { %v1078_v57 = vpop.permute.xlu1 %1077  ;;  %v1063_v54 = vsel %vm502_vm7, %v1060_v23, %v1062_v9  ;;  %v1064_v55 = vsel %vm502_vm7, %v1062_v9, %v1060_v23 }
 0x1cf   : > { %v1079_v49 = vsel %vm530_vm5, %v1076_v24, %v1078_v57  ;;  %v1080_v52 = vsel %vm530_vm5, %v1078_v57, %v1076_v24  ;;  %v1065_v17 = vmul.f32 %v1064_v55, %v2087_v11  ;;  %v1066_v18 = vmul.f32 %v1063_v54, %v2089_v39 }
 0x1d0   : > { %v1081_v48 = vmul.f32 %v1080_v52, %v2056_v20  ;;  %v1082_v47 = vmul.f32 %v1079_v49, %v2058_v6 }
 0x1d1   : > { %v1119_v28 = vrot.slane %v1065_v17, 4  ;;  %v1120_v3 = vrot.slane %v1066_v18, 4 }
 0x1d2   : > { %v1125_v2 = vrot.slane %v1081_v48, 4  ;;  %v1126_v4 = vrot.slane %v1082_v47, 4 }
 0x1d5   : > { %v1052_v8 = vpop.permute.xlu0 %1051 }
 0x1d6   : > { %v1068_v53 = vpop.permute.xlu1 %1067 }
 0x1d7   : > { %v1071_v56 = vsel %vm516_vm6, %v1068_v53, %v1070_v58  ;;  %v1072_v59 = vsel %vm516_vm6, %v1070_v58, %v1068_v53 }
 0x1d8   : > { %v1073_v63 = vmul.f32 %v1072_v59, %v2061_v21  ;;  %v1074_v5 = vmul.f32 %v1071_v56, %v2063_v22 }
 0x1da   : > { %v1143_v15 = vsel %vm479_vm0, %v1073_v63, %v1125_v2  ;;  %v1144_v16 = vsel %vm479_vm0, %v1074_v5, %v1126_v4 }
 0x1db   : > { %1173 = vmatpush.msrb.mxu0 %v1143_v15  ;;  %1193 = vmatpush.msrb.mxu1 %v1144_v16 }
 0x1dd   : > { %v877_v23 = vpop.permute.xlu0 %876 }
 0x1de   : > { %v879_v24 = vadd.f32 %v877_v23, %v870_v19  ;;  %v880_v26 = vadd.f32 %v877_v23, %v871_v7  ;;  %v1054_v27 = vpop.permute.xlu1 %1053 }
 0x1df   : > { %v1055_v29 = vsel %vm488_vm8, %v1052_v8, %v1054_v27  ;;  %v1056_v30 = vsel %vm488_vm8, %v1054_v27, %v1052_v8 }
 0x1e0   : > { %v2272_v13 = vmax.f32 %v879_v24, 0.0  ;;  %v2274_v31 = vmax.f32 %v880_v26, 0.0  ;;  %v1057_v32 = vmul.f32 %v1056_v30, %v2103_v50  ;;  %v1058_v38 = vmul.f32 %v1055_v29, %v2105_v51 }
 0x1e2   : > { %935 = vrot.lane.b32.xlu2 %v2274_v31, %s1804_s30  ;;  %941 = vrot.lane.b32.xlu0 %v2272_v13, %s1805_s13  ;;  %v1141_v43 = vsel %vm479_vm0, %v1057_v32, %v1119_v28  ;;  %v1142_v44 = vsel %vm479_vm0, %v1058_v38, %v1120_v3 }
 0x1e3   : > { %933 = vrot.lane.b32.xlu1 %v2272_v13, %s1804_s30  ;;  %1174 = vmatpush.msrb.mxu0 %v1141_v43 }
 0x1e4   : > { %1194 = vmatpush.msrb.mxu1 %v1142_v44  ;;  %1743 = vmatmul.msk.f32.vlgmr.msrb.gmra.mxu0 %vm813_vm10, %v1149_v14 }
 0x1e5   : > { %1745 = vmatmul.msk.f32.vlgmr.msrb.gmra.mxu1 %vm813_vm10, %v1149_v14 }
 0x1e6   : > { %v1204_v46 = vpop.permute.xlu1 %1203 }
 0x1ea   : > { %917 = vrot.lane.b32.xlu2 %v2272_v13, %s1807_s15  ;;  %919 = vrot.lane.b32.xlu0 %v2274_v31, %s1807_s15 }
 0x1eb   : > { %943 = vrot.lane.b32.xlu1 %v2274_v31, %s1805_s13 }
 0x1f2   : > { %927 = vrot.lane.b32.xlu2 %v2274_v31, %s1806_s14  ;;  %907 = vrot.lane.b32.xlu0 %v2272_v13, %s1808_s16 }
 0x1f3   : > { %925 = vrot.lane.b32.xlu1 %v2272_v13, %s1806_s14 }
 0x1fa   : > { %891 = vrot.lane.b32.xlu2 %v2272_v13, %s1810_s18  ;;  %893 = vrot.lane.b32.xlu0 %v2274_v31, %s1810_s18 }
 0x1fb   : > { %909 = vrot.lane.b32.xlu1 %v2274_v31, %s1808_s16 }
 0x202   : > { %901 = vrot.lane.b32.xlu2 %v2274_v31, %s1809_s17  ;;  %883 = vrot.lane.b32.xlu0 %v2272_v13, %s1811_s19 }
 0x203   : > { %899 = vrot.lane.b32.xlu1 %v2272_v13, %s1809_s17 }
 0x20b   : > { %885 = vrot.lane.b32.xlu1 %v2274_v31, %s1811_s19 }
 0x23c   : > { %v936_v9 = vpop.permute.xlu2 %935 }
 0x244   : > { %v918_v49 = vpop.permute.xlu2 %917 }
 0x24c   : > { %v928_v2 = vpop.permute.xlu2 %927 }
 0x254   : > { %v942_v57 = vpop.permute.xlu0 %941 }
 0x255   : > { %v934_v58 = vpop.permute.xlu1 %933 }
 0x256   : > { %v937_v47 = vsel %vm579_vm1, %v934_v58, %v936_v9  ;;  %v938_v8 = vsel %vm579_vm1, %v936_v9, %v934_v58  ;;  %v892_v9 = vpop.permute.xlu2 %891 }
 0x257   : > { %v939_v4 = vmul.f32 %v937_v47, %v1992_v36  ;;  %v940_v63 = vmul.f32 %v938_v8, %v1994_v37 }
 0x259   : > { %v969_v19 = vrot.slane %v939_v4, 4  ;;  %v970_v7 = vrot.slane %v940_v63, 4 }
 0x25c   : > { %v920_v52 = vpop.permute.xlu0 %919 }
 0x25d   : > { %v944_v48 = vpop.permute.xlu1 %943  ;;  %v921_v55 = vsel %vm551_vm4, %v918_v49, %v920_v52  ;;  %v922_v60 = vsel %vm551_vm4, %v920_v52, %v918_v49 }
 0x25e   : > { %v945_v53 = vsel %vm593_vm2, %v942_v57, %v944_v48  ;;  %v946_v54 = vsel %vm593_vm2, %v944_v48, %v942_v57  ;;  %v923_v10 = vmul.f32 %v921_v55, %v2030_v61  ;;  %v924_v16 = vmul.f32 %v922_v60, %v2032_v62  ;;  %v902_v8 = vpop.permute.xlu2 %901 }
 0x25f   : > { %v947_v56 = vmul.f32 %v945_v53, %v1984_v33  ;;  %v948_v59 = vmul.f32 %v946_v54, %v1986_v34 }
 0x260   : > { %v963_v26 = vrot.slane %v923_v10, 4  ;;  %v964_v29 = vrot.slane %v924_v16, 4 }
 0x261   : > { %1736 = vmatpush.msk.msrb.mxu2 %vm479_vm0, %v947_v56  ;;  %1738 = vmatpush.msk.msrb.mxu3 %vm479_vm0, %v948_v59  ;;  %v1176_v5 = vpop.f32.mrf.mxu0 }
 0x262   : > { %v1206_v12 = vmul.f32 %v1204_v46, %v1176_v5  ;;  %v1196_v15 = vpop.f32.mrf.mxu1 }
 0x263   : > { %v1207_v17 = vmul.f32 %v1204_v46, %v1196_v15  ;;  %v916_v46 = vmul.f32 %v2274_v31, %v1988_v35 }
 0x264   : > { %v1215_v18 = vadd.f32 %v1213_v45, %v1206_v12  ;;  %v908_v14 = vpop.permute.xlu0 %907 }
 0x265   : > { %v1216_v23 = vadd.f32 %v1213_v45, %v1207_v17  ;;  %v926_v24 = vpop.permute.xlu1 %925  ;;  %v915_v45 = vmul.f32 %v2272_v13, %v2000_v42  ;;  %v978_v58 = vsel %vm479_vm0, %v916_v46, %v964_v29  ;;  %v1753_v29 = vld [vmem:[%s2641_s10 + $0x10] sm:$0xf] }
 0x266   : > { %v2337_v27 = vmax.f32 %v1215_v18, 0.0  ;;  %v929_v28 = vsel %vm565_vm3, %v926_v24, %v928_v2  ;;  %v930_v3 = vsel %vm565_vm3, %v928_v2, %v926_v24 }
 0x267   : > { %v2343_v30 = vmax.f32 %v1216_v23, 0.0  ;;  %v931_v32 = vmul.f32 %v929_v28, %v1996_v40  ;;  %v932_v38 = vmul.f32 %v930_v3, %v1998_v41  ;;  %v977_v57 = vsel %vm479_vm0, %v915_v45, %v963_v26 }
 0x268   : > { %1277 = vrot.lane.b32.xlu1 %v2337_v27, %s1805_s13  ;;  %1269 = vrot.lane.b32.xlu2 %v2337_v27, %s1804_s30 }
 0x269   : > { %1271 = vrot.lane.b32.xlu0 %v2343_v30, %s1804_s30  ;;  %v979_v43 = vsel %vm479_vm0, %v931_v32, %v969_v19  ;;  %v980_v44 = vsel %vm479_vm0, %v932_v38, %v970_v7  ;;  %v1752_v32 = vld [vmem:[%s2640_s9 + $0x10] sm:$0xf] }
 0x26a   : > { %1003 = vmatpush.msrb.mxu2 %v979_v43  ;;  %1023 = vmatpush.msrb.mxu3 %v980_v44  ;;  %v981_v43 = vld [vmem:[%s2636_s5] sm:$0xf] }
 0x26c   : > { %1004 = vmatpush.msrb.mxu2 %v977_v57  ;;  %1024 = vmatpush.msrb.mxu3 %v978_v58  ;;  %v894_v13 = vpop.permute.xlu0 %893 }
 0x26d   : > { %v910_v49 = vpop.permute.xlu1 %909  ;;  %v895_v4 = vsel %vm502_vm7, %v892_v9, %v894_v13  ;;  %v896_v63 = vsel %vm502_vm7, %v894_v13, %v892_v9 }
 0x26e   : > { %v911_v52 = vsel %vm530_vm5, %v908_v14, %v910_v49  ;;  %v912_v48 = vsel %vm530_vm5, %v910_v49, %v908_v14  ;;  %v897_v12 = vmul.f32 %v896_v63, %v2087_v11  ;;  %v898_v15 = vmul.f32 %v895_v4, %v2089_v39 }
 0x26f   : > { %v913_v31 = vmul.f32 %v912_v48, %v2056_v20  ;;  %v914_v47 = vmul.f32 %v911_v52, %v2058_v6 }
 0x270   : > { %1255 = vrot.lane.b32.xlu1 %v2343_v30, %s1807_s15  ;;  %1279 = vrot.lane.b32.xlu2 %v2343_v30, %s1805_s13  ;;  %v951_v7 = vrot.slane %v897_v12, 4  ;;  %v952_v23 = vrot.slane %v898_v15, 4 }
 0x271   : > { %1253 = vrot.lane.b32.xlu0 %v2337_v27, %s1807_s15  ;;  %v957_v56 = vrot.slane %v913_v31, 4  ;;  %v958_v59 = vrot.slane %v914_v47, 4 }
 0x274   : > { %v884_v16 = vpop.permute.xlu0 %883 }
 0x275   : > { %v900_v53 = vpop.permute.xlu1 %899 }
 0x276   : > { %v903_v54 = vsel %vm516_vm6, %v900_v53, %v902_v8  ;;  %v904_v55 = vsel %vm516_vm6, %v902_v8, %v900_v53 }
 0x277   : > { %v905_v60 = vmul.f32 %v904_v55, %v2061_v21  ;;  %v906_v2 = vmul.f32 %v903_v54, %v2063_v22 }
 0x278   : > { %1243 = vrot.lane.b32.xlu1 %v2337_v27, %s1808_s16  ;;  %1261 = vrot.lane.b32.xlu2 %v2337_v27, %s1806_s14 }
 0x279   : > { %1263 = vrot.lane.b32.xlu0 %v2343_v30, %s1806_s14  ;;  %v975_v5 = vsel %vm479_vm0, %v905_v60, %v957_v56  ;;  %v976_v10 = vsel %vm479_vm0, %v906_v2, %v958_v59 }
 0x27a   : > { %1005 = vmatpush.msrb.mxu2 %v975_v5  ;;  %1025 = vmatpush.msrb.mxu3 %v976_v10 }
 0x27d   : > { %v886_v17 = vpop.permute.xlu1 %885 }
 0x27e   : > { %v887_v18 = vsel %vm488_vm8, %v884_v16, %v886_v17  ;;  %v888_v19 = vsel %vm488_vm8, %v886_v17, %v884_v16 }
 0x27f   : > { %v889_v24 = vmul.f32 %v888_v19, %v2103_v50  ;;  %v890_v26 = vmul.f32 %v887_v18, %v2105_v51 }
 0x280   : > { %1229 = vrot.lane.b32.xlu1 %v2343_v30, %s1810_s18  ;;  %1245 = vrot.lane.b32.xlu2 %v2343_v30, %s1808_s16 }
 0x281   : > { %1227 = vrot.lane.b32.xlu0 %v2337_v27, %s1810_s18  ;;  %v973_v28 = vsel %vm479_vm0, %v889_v24, %v951_v7  ;;  %v974_v3 = vsel %vm479_vm0, %v890_v26, %v952_v23  ;;  %v1251_v7 = vmul.f32 %v2337_v27, %v2000_v42  ;;  %v1252_v23 = vmul.f32 %v2343_v30, %v1988_v35 }
 0x282   : > { %1006 = vmatpush.msrb.mxu2 %v973_v28  ;;  %1026 = vmatpush.msrb.mxu3 %v974_v3 }
 0x283   : > { %1737 = vmatmul.msk.f32.vlgmr.msrb.gmra.mxu2 %vm813_vm10, %v981_v43  ;;  %1739 = vmatmul.msk.f32.vlgmr.msrb.gmra.mxu3 %vm813_vm10, %v981_v43 }
 0x288   : > { %1219 = vrot.lane.b32.xlu1 %v2337_v27, %s1811_s19  ;;  %1235 = vrot.lane.b32.xlu2 %v2337_v27, %s1809_s17 }
 0x289   : > { %1237 = vrot.lane.b32.xlu0 %v2343_v30, %s1809_s17 }
 0x290   : > { %1380 = vperm.xlu1 %1785, %v1753_v29   ;;  %1221 = vrot.lane.b32.xlu2 %v2343_v30, %s1811_s19 }
 0x291   : > { %1371 = vperm.xlu0 %1787, %v1752_v32  }
 0x2c2   : > { %v1270_v38 = vpop.permute.xlu2 %1269 }
 0x2ca   : > { %v1280_v14 = vpop.permute.xlu2 %1279 }
 0x2d2   : > { %v1262_v57 = vpop.permute.xlu2 %1261 }
 0x2da   : > { %v1278_v44 = vpop.permute.xlu1 %1277  ;;  %v1246_v47 = vpop.permute.xlu2 %1245 }
 0x2db   : > { %v1272_v45 = vpop.permute.xlu0 %1271  ;;  %v1281_v46 = vsel %vm593_vm2, %v1278_v44, %v1280_v14  ;;  %v1282_v9 = vsel %vm593_vm2, %v1280_v14, %v1278_v44 }
 0x2dc   : > { %v1283_v58 = vmul.f32 %v1281_v46, %v1984_v33  ;;  %v1284_v49 = vmul.f32 %v1282_v9, %v1986_v34  ;;  %v1273_v13 = vsel %vm579_vm1, %v1270_v38, %v1272_v45  ;;  %v1274_v31 = vsel %vm579_vm1, %v1272_v45, %v1270_v38 }
 0x2dd   : > { %v1275_v54 = vmul.f32 %v1273_v13, %v1992_v36  ;;  %v1276_v55 = vmul.f32 %v1274_v31, %v1994_v37 }
 0x2de   : > { %1748 = vmatpush.msk.msra.mxu2 %vm479_vm0, %v1283_v58  ;;  %1750 = vmatpush.msk.msra.mxu3 %vm479_vm0, %v1284_v49 }
 0x2df   : > { %v1305_v4 = vrot.slane %v1275_v54, 4  ;;  %v1306_v63 = vrot.slane %v1276_v55, 4 }
 0x2e2   : > { %v1256_v52 = vpop.permute.xlu1 %1255  ;;  %v1236_v24 = vpop.permute.xlu2 %1235 }
 0x2e3   : > { %v1254_v48 = vpop.permute.xlu0 %1253 }
 0x2e4   : > { %v1257_v8 = vsel %vm551_vm4, %v1254_v48, %v1256_v52  ;;  %v1258_v53 = vsel %vm551_vm4, %v1256_v52, %v1254_v48 }
 0x2e5   : > { %v1259_v56 = vmul.f32 %v1257_v8, %v2030_v61  ;;  %v1260_v59 = vmul.f32 %v1258_v53, %v2032_v62 }
 0x2e7   : > { %v1299_v12 = vrot.slane %v1259_v56, 4  ;;  %v1300_v15 = vrot.slane %v1260_v59, 4 }
 0x2e9   : > { %v1313_v26 = vsel %vm479_vm0, %v1251_v7, %v1299_v12  ;;  %v1314_v28 = vsel %vm479_vm0, %v1252_v23, %v1300_v15 }
 0x2ea   : > { %v1244_v60 = vpop.permute.xlu1 %1243  ;;  %v1222_v44 = vpop.permute.xlu2 %1221 }
 0x2eb   : > { %v1264_v2 = vpop.permute.xlu0 %1263  ;;  %v1247_v32 = vsel %vm530_vm5, %v1244_v60, %v1246_v47  ;;  %v1248_v27 = vsel %vm530_vm5, %v1246_v47, %v1244_v60 }
 0x2ec   : > { %v1265_v5 = vsel %vm565_vm3, %v1262_v57, %v1264_v2  ;;  %v1266_v10 = vsel %vm565_vm3, %v1264_v2, %v1262_v57  ;;  %v1249_v38 = vmul.f32 %v1248_v27, %v2056_v20  ;;  %v1250_v30 = vmul.f32 %v1247_v32, %v2058_v6  ;;  %v1317_v2 = vld [vmem:[%s2638_s7] sm:$0xf]  ;;  %v1759_v32 = vld [vmem:[%s2641_s10 + $0x14] sm:$0xf]  ;;  %v1741_v27 = vld [vmem:[%s2641_s10 + $0x8] sm:$0xf] }
 0x2ed   : > { %v1267_v16 = vmul.f32 %v1265_v5, %v1996_v40  ;;  %v1268_v17 = vmul.f32 %v1266_v10, %v1998_v41 }
 0x2ee   : > { %v1293_v52 = vrot.slane %v1249_v38, 4  ;;  %v1294_v48 = vrot.slane %v1250_v30, 4  ;;  %v1740_v38 = vld [vmem:[%s2640_s9 + $0x8] sm:$0xf] }
 0x2ef   : > { %v1315_v18 = vsel %vm479_vm0, %v1267_v16, %v1305_v4  ;;  %v1316_v19 = vsel %vm479_vm0, %v1268_v17, %v1306_v63 }
 0x2f0   : > { %1339 = vmatpush.msra.mxu2 %v1315_v18  ;;  %1359 = vmatpush.msra.mxu3 %v1316_v19 }
 0x2f2   : > { %1340 = vmatpush.msra.mxu2 %v1313_v26  ;;  %1360 = vmatpush.msra.mxu3 %v1314_v28  ;;  %v1230_v3 = vpop.permute.xlu1 %1229 }
 0x2f3   : > { %v1228_v29 = vpop.permute.xlu0 %1227 }
 0x2f4   : > { %v1231_v14 = vsel %vm502_vm7, %v1228_v29, %v1230_v3  ;;  %v1232_v43 = vsel %vm502_vm7, %v1230_v3, %v1228_v29 }
 0x2f5   : > { %v1233_v46 = vmul.f32 %v1232_v43, %v2087_v11  ;;  %v1234_v9 = vmul.f32 %v1231_v14, %v2089_v39 }
 0x2f7   : > { %v1287_v55 = vrot.slane %v1233_v46, 4  ;;  %v1288_v56 = vrot.slane %v1234_v9, 4 }
 0x2fa   : > { %v1220_v45 = vpop.permute.xlu1 %1219 }
 0x2fb   : > { %v1238_v57 = vpop.permute.xlu0 %1237  ;;  %v1223_v58 = vsel %vm488_vm8, %v1220_v45, %v1222_v44  ;;  %v1224_v49 = vsel %vm488_vm8, %v1222_v44, %v1220_v45 }
 0x2fc   : > { %v1239_v13 = vsel %vm516_vm6, %v1236_v24, %v1238_v57  ;;  %v1240_v31 = vsel %vm516_vm6, %v1238_v57, %v1236_v24  ;;  %v1225_v53 = vmul.f32 %v1224_v49, %v2103_v50  ;;  %v1226_v54 = vmul.f32 %v1223_v58, %v2105_v51 }
 0x2fd   : > { %v1241_v47 = vmul.f32 %v1240_v31, %v2061_v21  ;;  %v1242_v8 = vmul.f32 %v1239_v13, %v2063_v22 }
 0x2fe   : > { %v1309_v4 = vsel %vm479_vm0, %v1225_v53, %v1287_v55  ;;  %v1310_v63 = vsel %vm479_vm0, %v1226_v54, %v1288_v56 }
 0x2ff   : > { %v1311_v59 = vsel %vm479_vm0, %v1241_v47, %v1293_v52  ;;  %v1312_v60 = vsel %vm479_vm0, %v1242_v8, %v1294_v48 }
 0x300   : > { %1341 = vmatpush.msra.mxu2 %v1311_v59  ;;  %1361 = vmatpush.msra.mxu3 %v1312_v60 }
 0x302   : > { %1342 = vmatpush.msra.mxu2 %v1309_v4  ;;  %1362 = vmatpush.msra.mxu3 %v1310_v63  ;;  %v1381_v19 = vpop.permute.xlu1 %1380 }
 0x303   : > { %1749 = vmatmul.msk.f32.vlgmr.msra.gmra.mxu2 %vm813_vm10, %v1317_v2  ;;  %1751 = vmatmul.msk.f32.vlgmr.msra.gmra.mxu3 %vm813_vm10, %v1317_v2  ;;  %v1372_v12 = vpop.permute.xlu0 %1371 }
 0x306   : > { %v2493_v5 = vpop.f32.mrf.mxu2  ;;  %v2495_v10 = vpop.f32.mrf.mxu3 }
 0x386   : > { %v1344_v15 = vpop.f32.mrf.mxu2  ;;  %v1364_v16 = vpop.f32.mrf.mxu3 }
 0x387   : > { %v1374_v17 = vmul.f32 %v1372_v12, %v1344_v15  ;;  %v1375_v18 = vmul.f32 %v1372_v12, %v1364_v16 }
 0x389   : > { %v1383_v7 = vadd.f32 %v1381_v19, %v1374_v17  ;;  %v1384_v23 = vadd.f32 %v1381_v19, %v1375_v18 }
 0x38b   : > { %v2497_v24 = vmax.f32 %v1383_v7, 0.0  ;;  %v2499_v26 = vmax.f32 %v1384_v23, 0.0 }
 0x38d   : > { %v1602_v28 = vrot.slane %v2499_v26, 4  ;;  %1439 = vrot.lane.b32.xlu0 %v2499_v26, %s1804_s30  ;;  %1445 = vrot.lane.b32.xlu1 %v2497_v24, %s1805_s13  ;;  %v1419_v15 = vmul.f32 %v2497_v24, %v2000_v42  ;;  %v1420_v16 = vmul.f32 %v2499_v26, %v1988_v35 }
 0x38e   : > { %1437 = vrot.lane.b32.xlu2 %v2497_v24, %s1804_s30 }
 0x38f   : > { %v1603_v3 = vsel %vm479_vm0, %v2497_v24, %v1602_v28 }
 0x390   : > { %v1605_v29 = vadd.f32 %v1603_v3, %v1899_v1  ;;  %v1758_v1 = vld [vmem:[%s2640_s9 + $0x14] sm:$0xf] }
 0x392   : > { %1606 = vst [vmem:[%s446_s28] sm:$0xff] %v1605_v29 }
 0x395   : > { %1421 = vrot.lane.b32.xlu0 %v2497_v24, %s1807_s15  ;;  %1423 = vrot.lane.b32.xlu1 %v2499_v26, %s1807_s15 }
 0x396   : > { %1447 = vrot.lane.b32.xlu2 %v2499_v26, %s1805_s13 }
 0x39d   : > { %1431 = vrot.lane.b32.xlu0 %v2499_v26, %s1806_s14  ;;  %1411 = vrot.lane.b32.xlu1 %v2497_v24, %s1808_s16 }
 0x39e   : > { %1429 = vrot.lane.b32.xlu2 %v2497_v24, %s1806_s14 }
 0x3a5   : > { %1395 = vrot.lane.b32.xlu0 %v2497_v24, %s1810_s18  ;;  %1397 = vrot.lane.b32.xlu1 %v2499_v26, %s1810_s18 }
 0x3a6   : > { %1413 = vrot.lane.b32.xlu2 %v2499_v26, %s1808_s16 }
 0x3ad   : > { %1405 = vrot.lane.b32.xlu0 %v2499_v26, %s1809_s17  ;;  %1387 = vrot.lane.b32.xlu1 %v2497_v24, %s1811_s19 }
 0x3ae   : > { %1403 = vrot.lane.b32.xlu2 %v2497_v24, %s1809_s17 }
 0x3b5   : > { %1539 = vperm.xlu0 %1787, %v1758_v1   ;;  %1548 = vperm.xlu1 %1785, %v1759_v32  }
 0x3b6   : > { %1389 = vrot.lane.b32.xlu2 %v2499_v26, %s1811_s19 }
 0x3bd   : > { %1044 = vperm.xlu0 %1787, %v1741_v27  }
 0x3be   : > { %1035 = vperm.xlu2 %1786, %v1740_v38  }
 0x3e8   : > { %v1438_v30 = vpop.permute.xlu2 %1437 }
 0x3f0   : > { %v1448_v14 = vpop.permute.xlu2 %1447 }
 0x3f8   : > { %v1430_v45 = vpop.permute.xlu2 %1429 }
 0x3ff   : > { %v1440_v43 = vpop.permute.xlu0 %1439  ;;  %v1446_v44 = vpop.permute.xlu1 %1445 }
 0x400   : > { %v1449_v46 = vsel %vm593_vm2, %v1446_v44, %v1448_v14  ;;  %v1450_v9 = vsel %vm593_vm2, %v1448_v14, %v1446_v44  ;;  %v1441_v48 = vsel %vm579_vm1, %v1438_v30, %v1440_v43  ;;  %v1442_v13 = vsel %vm579_vm1, %v1440_v43, %v1438_v30  ;;  %v1414_v31 = vpop.permute.xlu2 %1413 }
 0x401   : > { %v1451_v57 = vmul.f32 %v1449_v46, %v1984_v33  ;;  %v1452_v58 = vmul.f32 %v1450_v9, %v1986_v34  ;;  %v1443_v34 = vmul.f32 %v1441_v48, %v1992_v36  ;;  %v1444_v8 = vmul.f32 %v1442_v13, %v1994_v37 }
 0x403   : > { %1754 = vmatpush.msk.msra.mxu0 %vm479_vm0, %v1451_v57  ;;  %1756 = vmatpush.msk.msra.mxu1 %vm479_vm0, %v1452_v58  ;;  %v1473_v59 = vrot.slane %v1443_v34, 4  ;;  %v1474_v60 = vrot.slane %v1444_v8, 4 }
 0x407   : > { %v1422_v49 = vpop.permute.xlu0 %1421  ;;  %v1424_v52 = vpop.permute.xlu1 %1423 }
 0x408   : > { %v1425_v47 = vsel %vm551_vm4, %v1422_v49, %v1424_v52  ;;  %v1426_v33 = vsel %vm551_vm4, %v1424_v52, %v1422_v49  ;;  %v1404_v17 = vpop.permute.xlu2 %1403 }
 0x409   : > { %v1427_v53 = vmul.f32 %v1425_v47, %v2030_v61  ;;  %v1428_v54 = vmul.f32 %v1426_v33, %v2032_v62 }
 0x40b   : > { %v1467_v63 = vrot.slane %v1427_v53, 4  ;;  %v1468_v12 = vrot.slane %v1428_v54, 4 }
 0x40d   : > { %v1481_v18 = vsel %vm479_vm0, %v1419_v15, %v1467_v63  ;;  %v1482_v19 = vsel %vm479_vm0, %v1420_v16, %v1468_v12 }
 0x40f   : > { %v1432_v55 = vpop.permute.xlu0 %1431  ;;  %v1412_v56 = vpop.permute.xlu1 %1411 }
 0x410   : > { %v1433_v2 = vsel %vm565_vm3, %v1430_v45, %v1432_v55  ;;  %v1434_v4 = vsel %vm565_vm3, %v1432_v55, %v1430_v45  ;;  %v1415_v7 = vsel %vm530_vm5, %v1412_v56, %v1414_v31  ;;  %v1416_v42 = vsel %vm530_vm5, %v1414_v31, %v1412_v56  ;;  %v1390_v28 = vpop.permute.xlu2 %1389 }
 0x411   : > { %v1435_v36 = vmul.f32 %v1433_v2, %v1996_v40  ;;  %v1436_v37 = vmul.f32 %v1434_v4, %v1998_v41  ;;  %v1417_v23 = vmul.f32 %v1416_v42, %v2056_v20  ;;  %v1418_v35 = vmul.f32 %v1415_v7, %v2058_v6 }
 0x413   : > { %v1483_v61 = vsel %vm479_vm0, %v1435_v36, %v1473_v59  ;;  %v1484_v62 = vsel %vm479_vm0, %v1436_v37, %v1474_v60  ;;  %v1461_v3 = vrot.slane %v1417_v23, 4  ;;  %v1462_v29 = vrot.slane %v1418_v35, 4 }
 0x414   : > { %1507 = vmatpush.msra.mxu0 %v1483_v61  ;;  %1527 = vmatpush.msra.mxu1 %v1484_v62 }
 0x416   : > { %1508 = vmatpush.msra.mxu0 %v1481_v18  ;;  %1528 = vmatpush.msra.mxu1 %v1482_v19 }
 0x417   : > { %v1396_v40 = vpop.permute.xlu0 %1395  ;;  %v1398_v41 = vpop.permute.xlu1 %1397 }
 0x418   : > { %v1399_v24 = vsel %vm502_vm7, %v1396_v40, %v1398_v41  ;;  %v1400_v26 = vsel %vm502_vm7, %v1398_v41, %v1396_v40  ;;  %v1036_v55 = vpop.permute.xlu2 %1035 }
 0x419   : > { %v1401_v1 = vmul.f32 %v1400_v26, %v2087_v11  ;;  %v1402_v32 = vmul.f32 %v1399_v24, %v2089_v39  ;;  %v1039_v4 = vmul.f32 %v1036_v55, %v2495_v10  ;;  %v1038_v36 = vmul.f32 %v1036_v55, %v2493_v5 }
 0x41b   : > { %v1455_v45 = vrot.slane %v1401_v1, 4  ;;  %v1456_v46 = vrot.slane %v1402_v32, 4 }
 0x41f   : > { %v1406_v27 = vpop.permute.xlu0 %1405  ;;  %v1388_v38 = vpop.permute.xlu1 %1387 }
 0x420   : > { %v1407_v20 = vsel %vm516_vm6, %v1404_v17, %v1406_v27  ;;  %v1408_v6 = vsel %vm516_vm6, %v1406_v27, %v1404_v17  ;;  %v1391_v30 = vsel %vm488_vm8, %v1388_v38, %v1390_v28  ;;  %v1392_v14 = vsel %vm488_vm8, %v1390_v28, %v1388_v38 }
 0x421   : > { %v1409_v43 = vmul.f32 %v1408_v6, %v2061_v21  ;;  %v1410_v11 = vmul.f32 %v1407_v20, %v2063_v22  ;;  %v1393_v39 = vmul.f32 %v1392_v14, %v2103_v50  ;;  %v1394_v44 = vmul.f32 %v1391_v30, %v2105_v51 }
 0x423   : > { %v1479_v9 = vsel %vm479_vm0, %v1409_v43, %v1461_v3  ;;  %v1480_v57 = vsel %vm479_vm0, %v1410_v11, %v1462_v29  ;;  %v1477_v21 = vsel %vm479_vm0, %v1393_v39, %v1455_v45  ;;  %v1478_v22 = vsel %vm479_vm0, %v1394_v44, %v1456_v46 }
 0x424   : > { %1509 = vmatpush.msra.mxu0 %v1479_v9  ;;  %1529 = vmatpush.msra.mxu1 %v1480_v57 }
 0x426   : > { %1510 = vmatpush.msra.mxu0 %v1477_v21  ;;  %1530 = vmatpush.msra.mxu1 %v1478_v22 }
 0x427   : > { %1755 = vmatmul.msk.f32.vlgmr.msra.gmra.mxu0 %vm813_vm10, %v1485_v25  ;;  %1757 = vmatmul.msk.f32.vlgmr.msra.gmra.mxu1 %vm813_vm10, %v1485_v25  ;;  %v1540_v50 = vpop.permute.xlu0 %1539  ;;  %v1549_v48 = vpop.permute.xlu1 %1548 }
 0x42f   : > { %v1045_v60 = vpop.permute.xlu0 %1044 }
 0x430   : > { %v1048_v37 = vadd.f32 %v1045_v60, %v1039_v4  ;;  %v1047_v41 = vadd.f32 %v1045_v60, %v1038_v36 }
 0x432   : > { %v1050_v23 = vmax.f32 %v1048_v37, 0.0  ;;  %v1049_v28 = vmax.f32 %v1047_v41, 0.0 }
 0x4a4   : > { %v1512_v51 = vpop.f32.mrf.mxu0  ;;  %v1532_v58 = vpop.f32.mrf.mxu1 }
 0x4a5   : > { %v1542_v49 = vmul.f32 %v1540_v50, %v1512_v51  ;;  %v1543_v52 = vmul.f32 %v1540_v50, %v1532_v58 }
 0x4a7   : > { %v1551_v13 = vadd.f32 %v1549_v48, %v1542_v49  ;;  %v1552_v31 = vadd.f32 %v1549_v48, %v1543_v52 }
 0x4a9   : > { %v1760_v47 = vmul.f32 -1.442695, %v1551_v13  ;;  %v1761_v33 = vmul.f32 -1.442695, %v1552_v31 }
 0x4ab   : > { %1788 = vpow2.f32 %v1760_v47 }
 0x4ac   : > { %1790 = vpow2.f32 %v1761_v33 }
 0x4b1   : > { %v1789_v34 = vpop.eup %1788 }
 0x4b2   : > { %v1791_v8 = vpop.eup %1790  ;;  %v1559_v53 = vadd.f32 1.0, %v1789_v34 }
 0x4b3   : > { %v1560_v54 = vadd.f32 1.0, %v1791_v8 }
 0x4b4   : > { %1792 = vrcp.f32 %v1559_v53  ;;  %v1572_v15 = vand.u32 2147483648, %v1559_v53  ;;  %v1570_v17 = vand.u32 2147483647, %v1559_v53  ;;  %vm1566_vm13 = vweird.f32 %v1559_v53 }
 0x4b5   : > { %1794 = vrcp.f32 %v1560_v54  ;;  %v1587_v16 = vand.u32 2147483648, %v1560_v54  ;;  %v1585_v19 = vand.u32 2147483647, %v1560_v54  ;;  %vm1581_vm15 = vweird.f32 %v1560_v54 }
 0x4b6   : > { %v1573_v42 = vor.u32 1.1754944e-38, %v1572_v15  ;;  %vm1571_vm2 = vcmp.eq.f32.partialorder %v1570_v17, 8.507059e+37 }
 0x4b7   : > { %v1588_v5 = vor.u32 1.1754944e-38, %v1587_v16  ;;  %vm1586_vm3 = vcmp.eq.f32.partialorder %v1585_v19, 8.507059e+37 }
 0x4ba   : > { %v1793_v56 = vpop.eup %1792 }
 0x4bb   : > { %v1795_v59 = vpop.eup %1794  ;;  %v1562_v2 = vmul.f32 %v1793_v56, %v1559_v53  ;;  %vm1567_vm11 = vweird.f32 %v1793_v56 }
 0x4bc   : > { %v1577_v63 = vmul.f32 %v1795_v59, %v1560_v54  ;;  %vm1582_vm12 = vweird.f32 %v1795_v59  ;;  %vm1568_vm14 = vmor %vm1566_vm13, %vm1567_vm11 }
 0x4bd   : > { %v1563_v12 = vsub.f32 1.0, %v1562_v2  ;;  %vm1583_vm1 = vmor %vm1581_vm15, %vm1582_vm12 }
 0x4be   : > { %v1578_v61 = vsub.f32 1.0, %v1577_v63 }
 0x4bf   : > { %v1564_v62 = vmul.f32 %v1793_v56, %v1563_v12 }
 0x4c0   : > { %v1579_v18 = vmul.f32 %v1795_v59, %v1578_v61 }
 0x4c1   : > { %v1565_v40 = vadd.f32 %v1793_v56, %v1564_v62 }
 0x4c2   : > { %v1580_v7 = vadd.f32 %v1795_v59, %v1579_v18 }
 0x4c3   : > { %v1569_v10 = vsel %vm1568_vm14, %v1793_v56, %v1565_v40 }
 0x4c4   : > { %v1584_v35 = vsel %vm1583_vm1, %v1795_v59, %v1580_v7  ;;  %v1574_v24 = vsel %vm1571_vm2, %v1573_v42, %v1569_v10 }
 0x4c5   : > { %v1589_v26 = vsel %vm1586_vm3, %v1588_v5, %v1584_v35  ;;  %v1591_v29 = vmul.f32 %v1574_v24, %v1049_v28 }
 0x4c6   : > { %v1592_v3 = vmul.f32 %v1589_v26, %v1050_v23 }
 0x4c8   : > { %v1595_v1 = vrot.slane %v1592_v3, 4 }
 0x4ca   : > { %v1596_v32 = vsel %vm479_vm0, %v1591_v29, %v1595_v1 }
 0x4cb   : > { %v1598_v27 = vadd.f32 %v1596_v32, %v1892_v0 }
 0x4cd   : > { %1599 = vst [vmem:[%s441_s25] sm:$0xff] %v1598_v27 }
 0x4ce PF: > { %s23_s21 = sadd.s32 1, %s1802_s21  }
 0x4cf   : > { %p20_p4 = scmp.ge.s32.totalorder %s23_s21, 4  }
 0x4d1   :  { %22 = sbr.rel (!%p20_p4) target bundleno = 1 (0x1), region = 128 }

</bundles_post_ra>
